<compile_context>
chip_gen: v7x
topology: tpu7x:2x2x1
jax: 0.10.0
libtpu: 0.0.40
codegen_flags: <defaults>
</compile_context>

<pallas_src>
import jax
import jax.numpy as jnp
from jax import lax
from jax.experimental import pallas as pl
from jax.experimental.pallas import tpu as pltpu

_BN_EPS = 1e-5
_LANE = 128


# --------------------------------------------------------------------------
# helpers
# --------------------------------------------------------------------------

def _round_up(d, m):
    return (d + m - 1) // m * m


def _pad_axis(a, axis, size):
    pad = size - a.shape[axis]
    if pad == 0:
        return a
    widths = [(0, 0)] * a.ndim
    widths[axis] = (0, pad)
    return jnp.pad(a, widths)


def _chip_vmem_limit():
    """Per-generation VMEM limit: ~85% of physical, clamped to 128 MiB."""
    try:
        cap = pltpu.get_tpu_info().vmem_capacity_bytes
        return int(min(int(cap * 0.85), 128 << 20))
    except Exception:
        return None  # fall back to the compiler default (ample for this size)


# --------------------------------------------------------------------------
# fused kernel
# --------------------------------------------------------------------------

def _bn_relu(h, gamma, beta):
    """Training-mode BatchNorm1d (biased variance) folded to scale/shift FMA,
    followed by ReLU.  `h` is (n, F) f32; gamma/beta are (1, F) f32."""
    inv_n = 1.0 / h.shape[0]
    mean = jnp.sum(h, axis=0, keepdims=True) * inv_n
    mean_sq = jnp.sum(h * h, axis=0, keepdims=True) * inv_n
    var = jnp.maximum(mean_sq - mean * mean, 0.0)
    scale = gamma * lax.rsqrt(var + _BN_EPS)       # (1, F)
    shift = beta - mean * scale                    # (1, F)
    return jnp.maximum(h * scale + shift, 0.0)


def _projector_kernel(x_ref, w1_ref, g1_ref, b1_ref,
                      w2_ref, g2_ref, b2_ref,
                      w3_ref, b3_ref, o_ref, h_ref):
    """Whole projector, fully VMEM-resident.  h_ref is a reused bf16 scratch
    holding the hidden activation between layers (never leaves VMEM).  The
    Linear1/Linear2 biases are omitted: cancelled by BN's mean subtraction."""
    # Layer 1: Linear -> BN -> ReLU
    h1 = jnp.dot(x_ref[...], w1_ref[...], preferred_element_type=jnp.float32)
    h_ref[...] = _bn_relu(h1, g1_ref[...], b1_ref[...]).astype(h_ref.dtype)

    # Layer 2: Linear -> BN -> ReLU
    h2 = jnp.dot(h_ref[...], w2_ref[...], preferred_element_type=jnp.float32)
    h_ref[...] = _bn_relu(h2, g2_ref[...], b2_ref[...]).astype(h_ref.dtype)

    # Layer 3: Linear + bias (lane-dense padded output, padded cols stay 0)
    out = jnp.dot(h_ref[...], w3_ref[...], preferred_element_type=jnp.float32)
    o_ref[...] = (out + b3_ref[...]).astype(o_ref.dtype)


# --------------------------------------------------------------------------
# module forward
# --------------------------------------------------------------------------

def projector_forward(x, params):
    """Pallas equivalent of Projector.forward: returns (x, proj(x))."""
    (w1, b1, g1, be1, w2, b2, g2, be2, w3, b3) = params
    # b1 / b2 feed directly into training-mode BatchNorm and are cancelled
    # exactly by the mean subtraction -> dropped (no compute, no DMA).
    del b1, b2

    n, input_dim = x.shape
    hidden = w1.shape[1]
    out_dim = w3.shape[1]
    k_pad = _round_up(input_dim, _LANE)
    h_pad = _round_up(hidden, _LANE)
    o_pad = _round_up(out_dim, _LANE)

    bf16 = jnp.bfloat16
    row = lambda a: a.reshape(1, -1).astype(jnp.float32)

    # Lane-dense zero padding of the contraction / feature axes.  Padded
    # columns of each weight are zero, padded BN features use gamma=beta=0,
    # and padded weight rows of the following layer are zero, so the math is
    # bit-for-bit unchanged while every operand is 128-lane aligned.
    xp = _pad_axis(x.astype(bf16), 1, k_pad)
    w1p = _pad_axis(_pad_axis(w1, 0, k_pad), 1, h_pad).astype(bf16)
    w2p = _pad_axis(_pad_axis(w2, 0, h_pad), 1, h_pad).astype(bf16)
    w3p = _pad_axis(_pad_axis(w3, 0, h_pad), 1, o_pad).astype(bf16)
    g1p, be1p = _pad_axis(row(g1), 1, h_pad), _pad_axis(row(be1), 1, h_pad)
    g2p, be2p = _pad_axis(row(g2), 1, h_pad), _pad_axis(row(be2), 1, h_pad)
    b3p = _pad_axis(row(b3), 1, o_pad)

    vmem_spec = pl.BlockSpec(memory_space=pltpu.MemorySpace.VMEM)
    vmem_limit = _chip_vmem_limit()
    cparams = (pltpu.CompilerParams(vmem_limit_bytes=vmem_limit)
               if vmem_limit is not None else pltpu.CompilerParams())

    proj = pl.pallas_call(
        _projector_kernel,
        out_shape=jax.ShapeDtypeStruct((n, o_pad), jnp.float32),
        in_specs=[vmem_spec] * 9,
        out_specs=vmem_spec,
        scratch_shapes=[pltpu.VMEM((n, h_pad), bf16)],
        compiler_params=cparams,
    )(xp, w1p, g1p, be1p, w2p, g2p, be2p, w3p, b3p)

    return x, proj[:, :out_dim]


# --------------------------------------------------------------------------
# params + pure-JAX reference
# --------------------------------------------------------------------------

def init_params(key, input_dim, out_dim, hidden):
    """Synthetic params matching PyTorch shapes; Linear weights stored
    pre-transposed as (in_features, out_features)."""
    ks = jax.random.split(key, 6)

    def lin(kw, kb, fan_in, fan_out):
        bound = 1.0 / (fan_in ** 0.5)
        w = jax.random.uniform(kw, (fan_in, fan_out), jnp.float32, -bound, bound)
        b = jax.random.uniform(kb, (fan_out,), jnp.float32, -bound, bound)
        return w, b

    w1, b1 = lin(ks[0], ks[1], input_dim, hidden)
    w2, b2 = lin(ks[2], ks[3], hidden, hidden)
    w3, b3 = lin(ks[4], ks[5], hidden, out_dim)

    g1 = jnp.ones((hidden,), jnp.float32)
    be1 = jnp.zeros((hidden,), jnp.float32)
    g2 = jnp.ones((hidden,), jnp.float32)
    be2 = jnp.zeros((hidden,), jnp.float32)
    return (w1, b1, g1, be1, w2, b2, g2, be2, w3, b3)


def reference_forward(x, params):
    """f32 pure-JAX reference (training-mode BN, biases included)."""
    (w1, b1, g1, be1, w2, b2, g2, be2, w3, b3) = params

    def bn_relu(h, g, be):
        m = jnp.mean(h, axis=0, keepdims=True)
        v = jnp.mean((h - m) ** 2, axis=0, keepdims=True)
        return jnp.maximum((h - m) / jnp.sqrt(v + _BN_EPS) * g + be, 0.0)

    h = bn_relu(x @ w1 + b1, g1, be1)
    h = bn_relu(h @ w2 + b2, g2, be2)
    return h @ w3 + b3


if __name__ == "__main__":
    # Small but TPU-meaningful shapes: input_dim=96 exercises the K-padding
    # path (96 -> 128), out_dim=64 exercises lane-dense output padding.
    batch, input_dim, hidden, out_dim = 64, 96, 512, 64

    key = jax.random.PRNGKey(0)
    kx, kp = jax.random.split(key)
    x = jax.random.normal(kx, (batch, input_dim), jnp.float32)
    params = init_params(kp, input_dim, out_dim, hidden)

    x_out, proj_out = jax.jit(projector_forward)(x, params)
    jax.block_until_ready((x_out, proj_out))

    ref = reference_forward(x, params)
    assert x_out.shape == x.shape
    assert proj_out.shape == (batch, out_dim)
    assert bool(jnp.all(x_out == x))
    # bf16 weights/activations vs the full-f32 reference -> loose tolerance.
    assert bool(jnp.allclose(proj_out, ref, atol=5e-2, rtol=5e-2))

    print("KERNEL_OK")
</pallas_src>

<mosaic_0001>
module attributes {stable_mosaic.version = 11 : i64} {
  func.func @_projector_kernel(%arg0: memref<64x128xbf16, #tpu.memory_space<vmem>>, %arg1: memref<128x512xbf16, #tpu.memory_space<vmem>>, %arg2: memref<1x512xf32, #tpu.memory_space<vmem>>, %arg3: memref<1x512xf32, #tpu.memory_space<vmem>>, %arg4: memref<512x512xbf16, #tpu.memory_space<vmem>>, %arg5: memref<1x512xf32, #tpu.memory_space<vmem>>, %arg6: memref<1x512xf32, #tpu.memory_space<vmem>>, %arg7: memref<512x128xbf16, #tpu.memory_space<vmem>>, %arg8: memref<1x128xf32, #tpu.memory_space<vmem>>, %arg9: memref<64x128xf32, #tpu.memory_space<vmem>>, %arg10: memref<64x512xbf16, #tpu.memory_space<vmem>>) attributes {dimension_semantics = [], scalar_prefetch = 0 : i64, scratch_operands = 1 : i64, tpu.core_type = #tpu.core_type<tc>} {
    %c0 = arith.constant 0 : index
    %c0_0 = arith.constant 0 : index
    %0 = vector.load %arg0[%c0, %c0_0] : memref<64x128xbf16, #tpu.memory_space<vmem>>, vector<64x128xbf16>
    %c0_1 = arith.constant 0 : index
    %c0_2 = arith.constant 0 : index
    %1 = vector.load %arg1[%c0_1, %c0_2] : memref<128x512xbf16, #tpu.memory_space<vmem>>, vector<128x512xbf16>
    %cst = arith.constant dense<0.000000e+00> : vector<64x512xf32>
    %2 = tpu.matmul %0, %1, %cst {dimension_numbers = #tpu.dot_dimension_numbers<[1], [0], [0], [1], [0, 0, 1, 1], [], []>} : vector<64x128xbf16>, vector<128x512xbf16>, vector<64x512xf32> -> vector<64x512xf32>
    %c0_3 = arith.constant 0 : index
    %c0_4 = arith.constant 0 : index
    %3 = vector.load %arg2[%c0_3, %c0_4] : memref<1x512xf32, #tpu.memory_space<vmem>>, vector<1x512xf32>
    %c0_5 = arith.constant 0 : index
    %c0_6 = arith.constant 0 : index
    %4 = vector.load %arg3[%c0_5, %c0_6] : memref<1x512xf32, #tpu.memory_space<vmem>>, vector<1x512xf32>
    %cst_7 = arith.constant dense<0.000000e+00> : vector<512xf32>
    %5 = vector.multi_reduction <add>, %2, %cst_7 [0] : vector<64x512xf32> to vector<512xf32>
    %6 = vector.shape_cast %5 : vector<512xf32> to vector<1x512xf32>
    %cst_8 = arith.constant 1.562500e-02 : f32
    %7 = vector.broadcast %cst_8 : f32 to vector<1x512xf32>
    %8 = arith.mulf %6, %7 : vector<1x512xf32>
    %9 = arith.mulf %2, %2 : vector<64x512xf32>
    %cst_9 = arith.constant dense<0.000000e+00> : vector<512xf32>
    %10 = vector.multi_reduction <add>, %9, %cst_9 [0] : vector<64x512xf32> to vector<512xf32>
    %11 = vector.shape_cast %10 : vector<512xf32> to vector<1x512xf32>
    %cst_10 = arith.constant 1.562500e-02 : f32
    %12 = vector.broadcast %cst_10 : f32 to vector<1x512xf32>
    %13 = arith.mulf %11, %12 : vector<1x512xf32>
    %14 = arith.mulf %8, %8 : vector<1x512xf32>
    %15 = arith.subf %13, %14 : vector<1x512xf32>
    %cst_11 = arith.constant 0.000000e+00 : f32
    %16 = vector.broadcast %cst_11 : f32 to vector<1x512xf32>
    %17 = arith.maximumf %15, %16 : vector<1x512xf32>
    %cst_12 = arith.constant 9.99999974E-6 : f32
    %18 = vector.broadcast %cst_12 : f32 to vector<1x512xf32>
    %19 = arith.addf %17, %18 : vector<1x512xf32>
    %20 = math.rsqrt %19 : vector<1x512xf32>
    %21 = arith.mulf %3, %20 : vector<1x512xf32>
    %22 = arith.mulf %8, %21 : vector<1x512xf32>
    %23 = arith.subf %4, %22 : vector<1x512xf32>
    %24 = vector.broadcast %21 : vector<1x512xf32> to vector<64x512xf32>
    %25 = arith.mulf %2, %24 : vector<64x512xf32>
    %26 = vector.broadcast %23 : vector<1x512xf32> to vector<64x512xf32>
    %27 = arith.addf %25, %26 : vector<64x512xf32>
    %cst_13 = arith.constant 0.000000e+00 : f32
    %28 = vector.broadcast %cst_13 : f32 to vector<64x512xf32>
    %29 = arith.maximumf %27, %28 : vector<64x512xf32>
    %30 = arith.truncf %29 : vector<64x512xf32> to vector<64x512xbf16>
    %c0_14 = arith.constant 0 : index
    %c0_15 = arith.constant 0 : index
    %31 = vector.load %arg10[%c0_14, %c0_15] : memref<64x512xbf16, #tpu.memory_space<vmem>>, vector<64x512xbf16>
    tpu.vector_store %arg10[%c0_14, %c0_15], %30 {strides = array<i32>} : memref<64x512xbf16, #tpu.memory_space<vmem>>, vector<64x512xbf16>,
    %c0_16 = arith.constant 0 : index
    %c0_17 = arith.constant 0 : index
    %32 = vector.load %arg10[%c0_16, %c0_17] : memref<64x512xbf16, #tpu.memory_space<vmem>>, vector<64x512xbf16>
    %c0_18 = arith.constant 0 : index
    %c0_19 = arith.constant 0 : index
    %33 = vector.load %arg4[%c0_18, %c0_19] : memref<512x512xbf16, #tpu.memory_space<vmem>>, vector<512x512xbf16>
    %cst_20 = arith.constant dense<0.000000e+00> : vector<64x512xf32>
    %34 = tpu.matmul %32, %33, %cst_20 {dimension_numbers = #tpu.dot_dimension_numbers<[1], [0], [0], [1], [0, 0, 1, 1], [], []>} : vector<64x512xbf16>, vector<512x512xbf16>, vector<64x512xf32> -> vector<64x512xf32>
    %c0_21 = arith.constant 0 : index
    %c0_22 = arith.constant 0 : index
    %35 = vector.load %arg5[%c0_21, %c0_22] : memref<1x512xf32, #tpu.memory_space<vmem>>, vector<1x512xf32>
    %c0_23 = arith.constant 0 : index
    %c0_24 = arith.constant 0 : index
    %36 = vector.load %arg6[%c0_23, %c0_24] : memref<1x512xf32, #tpu.memory_space<vmem>>, vector<1x512xf32>
    %cst_25 = arith.constant dense<0.000000e+00> : vector<512xf32>
    %37 = vector.multi_reduction <add>, %34, %cst_25 [0] : vector<64x512xf32> to vector<512xf32>
    %38 = vector.shape_cast %37 : vector<512xf32> to vector<1x512xf32>
    %cst_26 = arith.constant 1.562500e-02 : f32
    %39 = vector.broadcast %cst_26 : f32 to vector<1x512xf32>
    %40 = arith.mulf %38, %39 : vector<1x512xf32>
    %41 = arith.mulf %34, %34 : vector<64x512xf32>
    %cst_27 = arith.constant dense<0.000000e+00> : vector<512xf32>
    %42 = vector.multi_reduction <add>, %41, %cst_27 [0] : vector<64x512xf32> to vector<512xf32>
    %43 = vector.shape_cast %42 : vector<512xf32> to vector<1x512xf32>
    %cst_28 = arith.constant 1.562500e-02 : f32
    %44 = vector.broadcast %cst_28 : f32 to vector<1x512xf32>
    %45 = arith.mulf %43, %44 : vector<1x512xf32>
    %46 = arith.mulf %40, %40 : vector<1x512xf32>
    %47 = arith.subf %45, %46 : vector<1x512xf32>
    %cst_29 = arith.constant 0.000000e+00 : f32
    %48 = vector.broadcast %cst_29 : f32 to vector<1x512xf32>
    %49 = arith.maximumf %47, %48 : vector<1x512xf32>
    %cst_30 = arith.constant 9.99999974E-6 : f32
    %50 = vector.broadcast %cst_30 : f32 to vector<1x512xf32>
    %51 = arith.addf %49, %50 : vector<1x512xf32>
    %52 = math.rsqrt %51 : vector<1x512xf32>
    %53 = arith.mulf %35, %52 : vector<1x512xf32>
    %54 = arith.mulf %40, %53 : vector<1x512xf32>
    %55 = arith.subf %36, %54 : vector<1x512xf32>
    %56 = vector.broadcast %53 : vector<1x512xf32> to vector<64x512xf32>
    %57 = arith.mulf %34, %56 : vector<64x512xf32>
    %58 = vector.broadcast %55 : vector<1x512xf32> to vector<64x512xf32>
    %59 = arith.addf %57, %58 : vector<64x512xf32>
    %cst_31 = arith.constant 0.000000e+00 : f32
    %60 = vector.broadcast %cst_31 : f32 to vector<64x512xf32>
    %61 = arith.maximumf %59, %60 : vector<64x512xf32>
    %62 = arith.truncf %61 : vector<64x512xf32> to vector<64x512xbf16>
    %c0_32 = arith.constant 0 : index
    %c0_33 = arith.constant 0 : index
    %63 = vector.load %arg10[%c0_32, %c0_33] : memref<64x512xbf16, #tpu.memory_space<vmem>>, vector<64x512xbf16>
    tpu.vector_store %arg10[%c0_32, %c0_33], %62 {strides = array<i32>} : memref<64x512xbf16, #tpu.memory_space<vmem>>, vector<64x512xbf16>,
    %c0_34 = arith.constant 0 : index
    %c0_35 = arith.constant 0 : index
    %64 = vector.load %arg10[%c0_34, %c0_35] : memref<64x512xbf16, #tpu.memory_space<vmem>>, vector<64x512xbf16>
    %c0_36 = arith.constant 0 : index
    %c0_37 = arith.constant 0 : index
    %65 = vector.load %arg7[%c0_36, %c0_37] : memref<512x128xbf16, #tpu.memory_space<vmem>>, vector<512x128xbf16>
    %cst_38 = arith.constant dense<0.000000e+00> : vector<64x128xf32>
    %66 = tpu.matmul %64, %65, %cst_38 {dimension_numbers = #tpu.dot_dimension_numbers<[1], [0], [0], [1], [0, 0, 1, 1], [], []>} : vector<64x512xbf16>, vector<512x128xbf16>, vector<64x128xf32> -> vector<64x128xf32>
    %c0_39 = arith.constant 0 : index
    %c0_40 = arith.constant 0 : index
    %67 = vector.load %arg8[%c0_39, %c0_40] : memref<1x128xf32, #tpu.memory_space<vmem>>, vector<1x128xf32>
    %68 = vector.broadcast %67 : vector<1x128xf32> to vector<64x128xf32>
    %69 = arith.addf %66, %68 : vector<64x128xf32>
    %c0_41 = arith.constant 0 : index
    %c0_42 = arith.constant 0 : index
    %70 = vector.load %arg9[%c0_41, %c0_42] : memref<64x128xf32, #tpu.memory_space<vmem>>, vector<64x128xf32>
    tpu.vector_store %arg9[%c0_41, %c0_42], %69 {strides = array<i32>} : memref<64x128xf32, #tpu.memory_space<vmem>>, vector<64x128xf32>,
    return
  }
}

</mosaic_0001>

<bundles_post_ra>
// kernel: projector_forward.1
= control target key start
LH: loop header
LB: loop body
LE: loop exit
PB: predicated region body
PF: predicated region fallthrough
CT: control target
= control target key end

     0   :  { %v3343_v2 = vmov 0   ;;  %s4659_s0 = inlined_call_operand.vmem [shape: bf16[64,128], index: 0, kind: input, shape index: {}]   ;;  %s4660_s1 = inlined_call_operand.vmem [shape: bf16[128,512], index: 1, kind: input, shape index: {}]   ;;  %s4661_s2 = inlined_call_operand.vmem [shape: f32[1,512], index: 2, kind: input, shape index: {}]   ;;  %s4662_s3 = inlined_call_operand.vmem [shape: f32[1,512], index: 3, kind: input, shape index: {}]   ;;  %s4663_s4 = inlined_call_operand.vmem [shape: bf16[512,512], index: 4, kind: input, shape index: {}]   ;;  %s4664_s5 = inlined_call_operand.vmem [shape: f32[1,512], index: 5, kind: input, shape index: {}]   ;;  %s4665_s6 = inlined_call_operand.vmem [shape: f32[1,512], index: 6, kind: input, shape index: {}]   ;;  %s4666_s7 = inlined_call_operand.vmem [shape: bf16[512,128], index: 7, kind: input, shape index: {}]   ;;  %s4667_s8 = inlined_call_operand.vmem [shape: f32[1,128], index: 8, kind: input, shape index: {}]   ;;  %s4668_s9 = inlined_call_operand.hbm [shape: f32[64,128], index: 9, kind: output, shape index: {}]  }
   0x1   :  { %v3027_v0 = vld [vmem:[%s4660_s1 + $0x4] ss:$16 sps:$4 sm:$0xff]   ;;  %v3029_v1 = vld [vmem:[%s4660_s1 + $0xc] ss:$16 sps:$4 sm:$0xff]   ;;  %290 = vmatprep.mubr.bf16.mxu0 %v3343_v2  ;;  %363 = vmatprep.mubr.bf16.mxu1 %v3343_v2  ;;  %v3031_v3 = vld [vmem:[%s4660_s1] ss:$16 sps:$4 sm:$0xff]  }
   0x2   :  { %258 = vmatprep.subr.bf16.mxu0 %v3027_v0  ;;  %v3032_v4 = vld [vmem:[%s4660_s1 + $0x8] ss:$16 sps:$4 sm:$0xff]   ;;  %331 = vmatprep.subr.bf16.mxu1 %v3029_v1  ;;  %v3033_v5 = vld [vmem:[%s4660_s1 + $0x24] ss:$16 sps:$4 sm:$0xff]   ;;  %v3035_v6 = vld [vmem:[%s4660_s1 + $0x2c] ss:$16 sps:$4 sm:$0xff]  }
   0x3   :  { %259 = vmatpush1.bf16.msra.mxu0 %v3031_v3  ;;  %332 = vmatpush1.bf16.msra.mxu1 %v3032_v4  ;;  %v3037_v7 = vld [vmem:[%s4660_s1 + $0x20] ss:$16 sps:$4 sm:$0xff]   ;;  %v3038_v8 = vld [vmem:[%s4660_s1 + $0x28] ss:$16 sps:$4 sm:$0xff]   ;;  %v3039_v9 = vld [vmem:[%s4660_s1 + $0x44] ss:$16 sps:$4 sm:$0xff]  }
   0x4   :  { %260 = vmatprep.subr.bf16.mxu0 %v3033_v5  ;;  %333 = vmatprep.subr.bf16.mxu1 %v3035_v6  ;;  %v3041_v10 = vld [vmem:[%s4660_s1 + $0x4c] ss:$16 sps:$4 sm:$0xff]   ;;  %v3043_v11 = vld [vmem:[%s4660_s1 + $0x40] ss:$16 sps:$4 sm:$0xff]   ;;  %v3044_v12 = vld [vmem:[%s4660_s1 + $0x48] ss:$16 sps:$4 sm:$0xff]  }
   0x5   :  { %v3045_v13 = vld [vmem:[%s4660_s1 + $0x64] ss:$16 sps:$4 sm:$0xff]   ;;  %v3047_v14 = vld [vmem:[%s4660_s1 + $0x6c] ss:$16 sps:$4 sm:$0xff]   ;;  %v3049_v15 = vld [vmem:[%s4660_s1 + $0x60] ss:$16 sps:$4 sm:$0xff]  }
   0x6   :  { %v3050_v16 = vld [vmem:[%s4660_s1 + $0x68] ss:$16 sps:$4 sm:$0xff]   ;;  %v3051_v17 = vld [vmem:[%s4660_s1 + $0x84] ss:$16 sps:$4 sm:$0xff]   ;;  %v3053_v18 = vld [vmem:[%s4660_s1 + $0x8c] ss:$16 sps:$4 sm:$0xff]  }
   0x7   :  { %261 = vmatpush1.bf16.msra.mxu0 %v3037_v7  ;;  %334 = vmatpush1.bf16.msra.mxu1 %v3038_v8  ;;  %v3055_v19 = vld [vmem:[%s4660_s1 + $0x80] ss:$16 sps:$4 sm:$0xff]   ;;  %v3056_v20 = vld [vmem:[%s4660_s1 + $0x88] ss:$16 sps:$4 sm:$0xff]   ;;  %v3057_v21 = vld [vmem:[%s4660_s1 + $0xa4] ss:$16 sps:$4 sm:$0xff]  }
   0x8   :  { %262 = vmatprep.subr.bf16.mxu0 %v3039_v9  ;;  %335 = vmatprep.subr.bf16.mxu1 %v3041_v10  ;;  %v3059_v22 = vld [vmem:[%s4660_s1 + $0xac] ss:$16 sps:$4 sm:$0xff]   ;;  %v3061_v23 = vld [vmem:[%s4660_s1 + $0xa0] ss:$16 sps:$4 sm:$0xff]   ;;  %v3062_v24 = vld [vmem:[%s4660_s1 + $0xa8] ss:$16 sps:$4 sm:$0xff]  }
   0x9   :  { %v3063_v25 = vld [vmem:[%s4660_s1 + $0xc4] ss:$16 sps:$4 sm:$0xff]   ;;  %v3065_v26 = vld [vmem:[%s4660_s1 + $0xcc] ss:$16 sps:$4 sm:$0xff]   ;;  %v3067_v27 = vld [vmem:[%s4660_s1 + $0xc0] ss:$16 sps:$4 sm:$0xff]  }
   0xa   :  { %v3068_v28 = vld [vmem:[%s4660_s1 + $0xc8] ss:$16 sps:$4 sm:$0xff]   ;;  %v3069_v29 = vld [vmem:[%s4660_s1 + $0xe4] ss:$16 sps:$4 sm:$0xff]   ;;  %v3071_v30 = vld [vmem:[%s4660_s1 + $0xec] ss:$16 sps:$4 sm:$0xff]  }
   0xb   :  { %263 = vmatpush1.bf16.msra.mxu0 %v3043_v11  ;;  %336 = vmatpush1.bf16.msra.mxu1 %v3044_v12  ;;  %v3073_v31 = vld [vmem:[%s4660_s1 + $0xe0] ss:$16 sps:$4 sm:$0xff]   ;;  %v3074_v32 = vld [vmem:[%s4660_s1 + $0xe8] ss:$16 sps:$4 sm:$0xff]  }
   0xc   :  { %264 = vmatprep.subr.bf16.mxu0 %v3045_v13  ;;  %337 = vmatprep.subr.bf16.mxu1 %v3047_v14  ;;  %v3075_v33 = vld [vmem:[%s4659_s0] sm:$0xff]   ;;  %v3076_v34 = vld [vmem:[%s4659_s0 + $0x8] sm:$0xff]   ;;  %v3077_v35 = vld [vmem:[%s4659_s0 + $0x10] sm:$0xff]  }
   0xd   :  { %v3078_v36 = vld [vmem:[%s4659_s0 + $0x18] sm:$0xff]  }
   0xf   :  { %265 = vmatpush1.bf16.msra.mxu0 %v3049_v15  ;;  %338 = vmatpush1.bf16.msra.mxu1 %v3050_v16 }
  0x10   :  { %266 = vmatprep.subr.bf16.mxu0 %v3051_v17  ;;  %339 = vmatprep.subr.bf16.mxu1 %v3053_v18 }
  0x13   :  { %267 = vmatpush1.bf16.msra.mxu0 %v3055_v19  ;;  %340 = vmatpush1.bf16.msra.mxu1 %v3056_v20 }
  0x14   :  { %268 = vmatprep.subr.bf16.mxu0 %v3057_v21  ;;  %341 = vmatprep.subr.bf16.mxu1 %v3059_v22 }
  0x17   :  { %269 = vmatpush1.bf16.msra.mxu0 %v3061_v23  ;;  %342 = vmatpush1.bf16.msra.mxu1 %v3062_v24 }
  0x18   :  { %270 = vmatprep.subr.bf16.mxu0 %v3063_v25  ;;  %343 = vmatprep.subr.bf16.mxu1 %v3065_v26 }
  0x1b   :  { %271 = vmatpush1.bf16.msra.mxu0 %v3067_v27  ;;  %344 = vmatpush1.bf16.msra.mxu1 %v3068_v28 }
  0x1c   :  { %272 = vmatprep.subr.bf16.mxu0 %v3069_v29  ;;  %345 = vmatprep.subr.bf16.mxu1 %v3071_v30 }
  0x1f   :  { %273 = vmatpush1.bf16.msra.mxu0 %v3073_v31  ;;  %346 = vmatpush1.bf16.msra.mxu1 %v3074_v32 }
  0x22   :  { %291 = vmatmul.mubr.bf16.vlgmr.msra.gmra.mrb[0].mxu0 %v3075_v33  ;;  %364 = vmatmul.mubr.bf16.vlgmr.msra.gmra.mrb[0].mxu1 %v3075_v33 }
  0x23   :  { %300 = vmatprep.mubr.bf16.mxu0 %v3343_v2  ;;  %373 = vmatprep.mubr.bf16.mxu1 %v3343_v2 }
  0x2a   :  { %301 = vmatmul.mubr.bf16.gmra.mrb[4].mxu0 %v3076_v34  ;;  %374 = vmatmul.mubr.bf16.gmra.mrb[4].mxu1 %v3076_v34 }
  0x2b   :  { %310 = vmatprep.mubr.bf16.mxu0 %v3343_v2  ;;  %383 = vmatprep.mubr.bf16.mxu1 %v3343_v2 }
  0x32   :  { %311 = vmatmul.mubr.bf16.gmra.mrb[8].mxu0 %v3077_v35  ;;  %384 = vmatmul.mubr.bf16.gmra.mrb[8].mxu1 %v3077_v35 }
  0x33   :  { %320 = vmatprep.mubr.bf16.mxu0 %v3343_v2  ;;  %393 = vmatprep.mubr.bf16.mxu1 %v3343_v2 }
  0x3a   :  { %321 = vmatmul.mubr.bf16.gmra.mrb[12].mxu0 %v3078_v36  ;;  %394 = vmatmul.mubr.bf16.gmra.mrb[12].mxu1 %v3078_v36 }
  0x3b   :  { %14 = vsyncpa [#allocation4], 0  ;;  %v3081_v37 = vld [vmem:[%s4663_s4 + $0x4] ss:$16 sps:$4 sm:$0xff]   ;;  %v3084_v38 = vld [vmem:[%s4663_s4 + $0xc] ss:$16 sps:$4 sm:$0xff]  }
  0x3c   :  { %v3079_v39 = vld [vmem:[%s4663_s4] ss:$16 sps:$4 sm:$0xff]   ;;  %v3082_v40 = vld [vmem:[%s4663_s4 + $0x8] ss:$16 sps:$4 sm:$0xff]   ;;  %1588 = vmatprep.subr.bf16.mxu0 %v3081_v37  ;;  %1734 = vmatprep.subr.bf16.mxu1 %v3084_v38  ;;  %v3087_v41 = vld [vmem:[%s4663_s4 + $0x24] ss:$16 sps:$4 sm:$0xff]  }
  0x3d   :  { %1589 = vmatpush1.bf16.msra.mxu0 %v3079_v39  ;;  %1735 = vmatpush1.bf16.msra.mxu1 %v3082_v40  ;;  %v3090_v42 = vld [vmem:[%s4663_s4 + $0x2c] ss:$16 sps:$4 sm:$0xff]   ;;  %v3085_v43 = vld [vmem:[%s4663_s4 + $0x20] ss:$16 sps:$4 sm:$0xff]   ;;  %v3088_v44 = vld [vmem:[%s4663_s4 + $0x28] ss:$16 sps:$4 sm:$0xff]  }
  0x3e   :  { %1590 = vmatprep.subr.bf16.mxu0 %v3087_v41  ;;  %1736 = vmatprep.subr.bf16.mxu1 %v3090_v42  ;;  %v3093_v45 = vld [vmem:[%s4663_s4 + $0x44] ss:$16 sps:$4 sm:$0xff]   ;;  %v3096_v46 = vld [vmem:[%s4663_s4 + $0x4c] ss:$16 sps:$4 sm:$0xff]   ;;  %v3091_v47 = vld [vmem:[%s4663_s4 + $0x40] ss:$16 sps:$4 sm:$0xff]  }
  0x3f   :  { %v3094_v48 = vld [vmem:[%s4663_s4 + $0x48] ss:$16 sps:$4 sm:$0xff]   ;;  %v3099_v49 = vld [vmem:[%s4663_s4 + $0x64] ss:$16 sps:$4 sm:$0xff]   ;;  %v3102_v50 = vld [vmem:[%s4663_s4 + $0x6c] ss:$16 sps:$4 sm:$0xff]  }
  0x40   :  { %v3097_v51 = vld [vmem:[%s4663_s4 + $0x60] ss:$16 sps:$4 sm:$0xff]   ;;  %v3100_v52 = vld [vmem:[%s4663_s4 + $0x68] ss:$16 sps:$4 sm:$0xff]   ;;  %v3105_v53 = vld [vmem:[%s4663_s4 + $0x84] ss:$16 sps:$4 sm:$0xff]  }
  0x41   :  { %1591 = vmatpush1.bf16.msra.mxu0 %v3085_v43  ;;  %1737 = vmatpush1.bf16.msra.mxu1 %v3088_v44  ;;  %v3108_v54 = vld [vmem:[%s4663_s4 + $0x8c] ss:$16 sps:$4 sm:$0xff]   ;;  %v3103_v55 = vld [vmem:[%s4663_s4 + $0x80] ss:$16 sps:$4 sm:$0xff]   ;;  %v3106_v56 = vld [vmem:[%s4663_s4 + $0x88] ss:$16 sps:$4 sm:$0xff]  }
  0x42   :  { %1592 = vmatprep.subr.bf16.mxu0 %v3093_v45  ;;  %1738 = vmatprep.subr.bf16.mxu1 %v3096_v46  ;;  %v3111_v57 = vld [vmem:[%s4663_s4 + $0xa4] ss:$16 sps:$4 sm:$0xff]   ;;  %v3114_v58 = vld [vmem:[%s4663_s4 + $0xac] ss:$16 sps:$4 sm:$0xff]   ;;  %v3109_v59 = vld [vmem:[%s4663_s4 + $0xa0] ss:$16 sps:$4 sm:$0xff]  }
  0x43   :  { %v3112_v60 = vld [vmem:[%s4663_s4 + $0xa8] ss:$16 sps:$4 sm:$0xff]   ;;  %v3117_v61 = vld [vmem:[%s4663_s4 + $0xc4] ss:$16 sps:$4 sm:$0xff]   ;;  %v3120_v62 = vld [vmem:[%s4663_s4 + $0xcc] ss:$16 sps:$4 sm:$0xff]  }
  0x44   :  { %v3115_v63 = vld [vmem:[%s4663_s4 + $0xc0] ss:$16 sps:$4 sm:$0xff]   ;;  %v3118_v0 = vld [vmem:[%s4663_s4 + $0xc8] ss:$16 sps:$4 sm:$0xff]   ;;  %v3123_v1 = vld [vmem:[%s4663_s4 + $0xe4] ss:$16 sps:$4 sm:$0xff]  }
  0x45   :  { %1593 = vmatpush1.bf16.msra.mxu0 %v3091_v47  ;;  %1739 = vmatpush1.bf16.msra.mxu1 %v3094_v48  ;;  %v3126_v2 = vld [vmem:[%s4663_s4 + $0xec] ss:$16 sps:$4 sm:$0xff]   ;;  %v3121_v3 = vld [vmem:[%s4663_s4 + $0xe0] ss:$16 sps:$4 sm:$0xff]   ;;  %v3124_v4 = vld [vmem:[%s4663_s4 + $0xe8] ss:$16 sps:$4 sm:$0xff]  }
  0x46   :  { %1594 = vmatprep.subr.bf16.mxu0 %v3099_v49  ;;  %1740 = vmatprep.subr.bf16.mxu1 %v3102_v50  ;;  %v3129_v5 = vld [vmem:[%s4663_s4 + $0x104] ss:$16 sps:$4 sm:$0xff]   ;;  %v3132_v6 = vld [vmem:[%s4663_s4 + $0x10c] ss:$16 sps:$4 sm:$0xff]   ;;  %v3127_v7 = vld [vmem:[%s4663_s4 + $0x100] ss:$16 sps:$4 sm:$0xff]  }
  0x47   :  { %v3130_v8 = vld [vmem:[%s4663_s4 + $0x108] ss:$16 sps:$4 sm:$0xff]   ;;  %v3135_v9 = vld [vmem:[%s4663_s4 + $0x124] ss:$16 sps:$4 sm:$0xff]   ;;  %v3138_v10 = vld [vmem:[%s4663_s4 + $0x12c] ss:$16 sps:$4 sm:$0xff]  }
  0x48   :  { %v3133_v11 = vld [vmem:[%s4663_s4 + $0x120] ss:$16 sps:$4 sm:$0xff]   ;;  %v3136_v12 = vld [vmem:[%s4663_s4 + $0x128] ss:$16 sps:$4 sm:$0xff]   ;;  %v3141_v13 = vld [vmem:[%s4663_s4 + $0x144] ss:$16 sps:$4 sm:$0xff]  }
  0x49   :  { %1595 = vmatpush1.bf16.msra.mxu0 %v3097_v51  ;;  %1741 = vmatpush1.bf16.msra.mxu1 %v3100_v52  ;;  %v3144_v14 = vld [vmem:[%s4663_s4 + $0x14c] ss:$16 sps:$4 sm:$0xff]   ;;  %v3139_v15 = vld [vmem:[%s4663_s4 + $0x140] ss:$16 sps:$4 sm:$0xff]   ;;  %v3142_v16 = vld [vmem:[%s4663_s4 + $0x148] ss:$16 sps:$4 sm:$0xff]  }
  0x4a   :  { %1596 = vmatprep.subr.bf16.mxu0 %v3105_v53  ;;  %1742 = vmatprep.subr.bf16.mxu1 %v3108_v54  ;;  %v3147_v17 = vld [vmem:[%s4663_s4 + $0x164] ss:$16 sps:$4 sm:$0xff]   ;;  %v3150_v18 = vld [vmem:[%s4663_s4 + $0x16c] ss:$16 sps:$4 sm:$0xff]   ;;  %v3145_v19 = vld [vmem:[%s4663_s4 + $0x160] ss:$16 sps:$4 sm:$0xff]  }
  0x4b   :  { %v3148_v20 = vld [vmem:[%s4663_s4 + $0x168] ss:$16 sps:$4 sm:$0xff]   ;;  %v3153_v21 = vld [vmem:[%s4663_s4 + $0x184] ss:$16 sps:$4 sm:$0xff]   ;;  %v3156_v22 = vld [vmem:[%s4663_s4 + $0x18c] ss:$16 sps:$4 sm:$0xff]  }
  0x4c   :  { %v3151_v23 = vld [vmem:[%s4663_s4 + $0x180] ss:$16 sps:$4 sm:$0xff]   ;;  %v3154_v24 = vld [vmem:[%s4663_s4 + $0x188] ss:$16 sps:$4 sm:$0xff]   ;;  %v3159_v25 = vld [vmem:[%s4663_s4 + $0x1a4] ss:$16 sps:$4 sm:$0xff]  }
  0x4d   :  { %1597 = vmatpush1.bf16.msra.mxu0 %v3103_v55  ;;  %1743 = vmatpush1.bf16.msra.mxu1 %v3106_v56  ;;  %v3162_v26 = vld [vmem:[%s4663_s4 + $0x1ac] ss:$16 sps:$4 sm:$0xff]   ;;  %v3157_v27 = vld [vmem:[%s4663_s4 + $0x1a0] ss:$16 sps:$4 sm:$0xff]   ;;  %v3160_v28 = vld [vmem:[%s4663_s4 + $0x1a8] ss:$16 sps:$4 sm:$0xff]  }
  0x4e   :  { %1598 = vmatprep.subr.bf16.mxu0 %v3111_v57  ;;  %1744 = vmatprep.subr.bf16.mxu1 %v3114_v58  ;;  %v3165_v29 = vld [vmem:[%s4663_s4 + $0x1c4] ss:$16 sps:$4 sm:$0xff]   ;;  %v3168_v30 = vld [vmem:[%s4663_s4 + $0x1cc] ss:$16 sps:$4 sm:$0xff]   ;;  %v3163_v31 = vld [vmem:[%s4663_s4 + $0x1c0] ss:$16 sps:$4 sm:$0xff]  }
  0x4f   :  { %v3166_v32 = vld [vmem:[%s4663_s4 + $0x1c8] ss:$16 sps:$4 sm:$0xff]   ;;  %v3169_v33 = vld [vmem:[%s4663_s4 + $0x1e0] ss:$16 sps:$4 sm:$0xff]   ;;  %v3171_v34 = vld [vmem:[%s4663_s4 + $0x1e4] ss:$16 sps:$4 sm:$0xff]  }
  0x50   :  { %v3172_v35 = vld [vmem:[%s4663_s4 + $0x1e8] ss:$16 sps:$4 sm:$0xff]   ;;  %v3174_v36 = vld [vmem:[%s4663_s4 + $0x1ec] ss:$16 sps:$4 sm:$0xff]   ;;  %v3177_v37 = vld [vmem:[%s4663_s4 + $0x204] ss:$16 sps:$4 sm:$0xff]  }
  0x51   :  { %1599 = vmatpush1.bf16.msra.mxu0 %v3109_v59  ;;  %1745 = vmatpush1.bf16.msra.mxu1 %v3112_v60  ;;  %v3180_v38 = vld [vmem:[%s4663_s4 + $0x20c] ss:$16 sps:$4 sm:$0xff]  }
  0x52   :  { %1600 = vmatprep.subr.bf16.mxu0 %v3117_v61  ;;  %1746 = vmatprep.subr.bf16.mxu1 %v3120_v62 }
  0x55   :  { %1601 = vmatpush1.bf16.msra.mxu0 %v3115_v63  ;;  %1747 = vmatpush1.bf16.msra.mxu1 %v3118_v0 }
  0x56   :  { %1602 = vmatprep.subr.bf16.mxu0 %v3123_v1  ;;  %1748 = vmatprep.subr.bf16.mxu1 %v3126_v2 }
  0x59   :  { %1603 = vmatpush1.bf16.msra.mxu0 %v3121_v3  ;;  %1749 = vmatpush1.bf16.msra.mxu1 %v3124_v4 }
  0x5a   :  { %1604 = vmatprep.subr.bf16.mxu0 %v3129_v5  ;;  %1750 = vmatprep.subr.bf16.mxu1 %v3132_v6 }
  0x5d   :  { %1605 = vmatpush1.bf16.msra.mxu0 %v3127_v7  ;;  %1751 = vmatpush1.bf16.msra.mxu1 %v3130_v8 }
  0x5e   :  { %1606 = vmatprep.subr.bf16.mxu0 %v3135_v9  ;;  %1752 = vmatprep.subr.bf16.mxu1 %v3138_v10 }
  0x61   :  { %1607 = vmatpush1.bf16.msra.mxu0 %v3133_v11  ;;  %1753 = vmatpush1.bf16.msra.mxu1 %v3136_v12 }
  0x62   :  { %1608 = vmatprep.subr.bf16.mxu0 %v3141_v13  ;;  %1754 = vmatprep.subr.bf16.mxu1 %v3144_v14 }
  0x65   :  { %1609 = vmatpush1.bf16.msra.mxu0 %v3139_v15  ;;  %1755 = vmatpush1.bf16.msra.mxu1 %v3142_v16 }
  0x66   :  { %1610 = vmatprep.subr.bf16.mxu0 %v3147_v17  ;;  %1756 = vmatprep.subr.bf16.mxu1 %v3150_v18 }
  0x69   :  { %1611 = vmatpush1.bf16.msra.mxu0 %v3145_v19  ;;  %1757 = vmatpush1.bf16.msra.mxu1 %v3148_v20 }
  0x6a   :  { %1612 = vmatprep.subr.bf16.mxu0 %v3153_v21  ;;  %1758 = vmatprep.subr.bf16.mxu1 %v3156_v22 }
  0x6d   :  { %1613 = vmatpush1.bf16.msra.mxu0 %v3151_v23  ;;  %1759 = vmatpush1.bf16.msra.mxu1 %v3154_v24 }
  0x6e   :  { %1614 = vmatprep.subr.bf16.mxu0 %v3159_v25  ;;  %1760 = vmatprep.subr.bf16.mxu1 %v3162_v26 }
  0x71   :  { %1615 = vmatpush1.bf16.msra.mxu0 %v3157_v27  ;;  %1761 = vmatpush1.bf16.msra.mxu1 %v3160_v28 }
  0x72   :  { %1616 = vmatprep.subr.bf16.mxu0 %v3165_v29  ;;  %1762 = vmatprep.subr.bf16.mxu1 %v3168_v30 }
  0x75   :  { %1617 = vmatpush1.bf16.msra.mxu0 %v3163_v31  ;;  %1763 = vmatpush1.bf16.msra.mxu1 %v3166_v32 }
  0x76   :  { %1618 = vmatprep.subr.bf16.mxu0 %v3171_v34  ;;  %1764 = vmatprep.subr.bf16.mxu1 %v3174_v36 }
  0x79   :  { %1619 = vmatpush1.bf16.msra.mxu0 %v3169_v33  ;;  %1765 = vmatpush1.bf16.msra.mxu1 %v3172_v35 }
  0x7a   :  { %1661 = vmatprep.subr.bf16.mxu0 %v3177_v37  ;;  %1807 = vmatprep.subr.bf16.mxu1 %v3180_v38 }
  0xf5   :  { %v3712_v39 = vpop.f32.mrb[0].mxu0  ;;  %v3714_v40 = vpop.f32.mrb[0].mxu1 }
  0xf6   :  { %v3716_v41 = vpop.f32.mrb[1].mxu0  ;;  %v3718_v42 = vpop.f32.mrb[1].mxu1  ;;  %v462_v43 = vmul.f32 %v3712_v39, %v3712_v39  ;;  %v464_v44 = vmul.f32 %v3714_v40, %v3714_v40 }
  0xf7   :  { %v463_v45 = vmul.f32 %v3716_v41, %v3716_v41  ;;  %v465_v46 = vmul.f32 %v3718_v42, %v3718_v42  ;;  %v3728_v47 = vpop.f32.mrb[2].mxu0  ;;  %v3730_v48 = vpop.f32.mrb[2].mxu1 }
  0xf8   :  { %v406_v49 = vadd.f32 %v3728_v47, %v3712_v39  ;;  %v466_v50 = vmul.f32 %v3728_v47, %v3728_v47  ;;  %v432_v51 = vadd.f32 %v3730_v48, %v3714_v40  ;;  %v468_v52 = vmul.f32 %v3730_v48, %v3730_v48  ;;  %v3740_v53 = vpop.f32.mrb[3].mxu0  ;;  %v3742_v54 = vpop.f32.mrb[3].mxu1 }
  0xf9   :  { %v419_v55 = vadd.f32 %v3740_v53, %v3716_v41  ;;  %v467_v56 = vmul.f32 %v3740_v53, %v3740_v53  ;;  %v445_v57 = vadd.f32 %v3742_v54, %v3718_v42  ;;  %v469_v58 = vmul.f32 %v3742_v54, %v3742_v54 }
  0xfa   :  { %v494_v59 = vadd.f32 %v466_v50, %v462_v43  ;;  %v520_v60 = vadd.f32 %v468_v52, %v464_v44 }
  0xfb   :  { %v507_v61 = vadd.f32 %v467_v56, %v463_v45  ;;  %v533_v62 = vadd.f32 %v469_v58, %v465_v46 }
  0xfd   :  { %v3752_v63 = vpop.f32.mrb[4].mxu0  ;;  %v3754_v0 = vpop.f32.mrb[4].mxu1 }
  0xfe   :  { %v407_v1 = vadd.f32 %v406_v49, %v3752_v63  ;;  %v470_v2 = vmul.f32 %v3752_v63, %v3752_v63  ;;  %v433_v3 = vadd.f32 %v432_v51, %v3754_v0  ;;  %v472_v4 = vmul.f32 %v3754_v0, %v3754_v0  ;;  %v3762_v5 = vpop.f32.mrb[5].mxu0  ;;  %v3764_v6 = vpop.f32.mrb[5].mxu1 }
  0xff   :  { %v420_v7 = vadd.f32 %v419_v55, %v3762_v5  ;;  %v471_v8 = vmul.f32 %v3762_v5, %v3762_v5  ;;  %v446_v9 = vadd.f32 %v445_v57, %v3764_v6  ;;  %v473_v10 = vmul.f32 %v3764_v6, %v3764_v6  ;;  %v3772_v11 = vpop.f32.mrb[6].mxu0  ;;  %v3774_v12 = vpop.f32.mrb[6].mxu1 }
 0x100   :  { %v495_v13 = vadd.f32 %v494_v59, %v470_v2  ;;  %v521_v14 = vadd.f32 %v520_v60, %v472_v4  ;;  %v408_v15 = vadd.f32 %v407_v1, %v3772_v11  ;;  %v474_v16 = vmul.f32 %v3772_v11, %v3772_v11  ;;  %v3779_v17 = vpop.f32.mrb[7].mxu0  ;;  %v3781_v18 = vpop.f32.mrb[7].mxu1 }
 0x101   :  { %v508_v19 = vadd.f32 %v507_v61, %v471_v8  ;;  %v534_v20 = vadd.f32 %v533_v62, %v473_v10  ;;  %v434_v21 = vadd.f32 %v433_v3, %v3774_v12  ;;  %v476_v22 = vmul.f32 %v3774_v12, %v3774_v12 }
 0x102   :  { %v496_v23 = vadd.f32 %v495_v13, %v474_v16  ;;  %v421_v24 = vadd.f32 %v420_v7, %v3779_v17  ;;  %v475_v25 = vmul.f32 %v3779_v17, %v3779_v17  ;;  %v447_v26 = vadd.f32 %v446_v9, %v3781_v18 }
 0x103   :  { %v522_v27 = vadd.f32 %v521_v14, %v476_v22  ;;  %v477_v28 = vmul.f32 %v3781_v18, %v3781_v18 }
 0x104   :  { %v509_v29 = vadd.f32 %v508_v19, %v475_v25 }
 0x105   :  { %v535_v30 = vadd.f32 %v534_v20, %v477_v28  ;;  %v3792_v31 = vpop.f32.mrb[8].mxu0  ;;  %v3794_v32 = vpop.f32.mrb[8].mxu1 }
 0x106   :  { %v409_v33 = vadd.f32 %v408_v15, %v3792_v31  ;;  %v478_v34 = vmul.f32 %v3792_v31, %v3792_v31  ;;  %v435_v35 = vadd.f32 %v434_v21, %v3794_v32  ;;  %v480_v36 = vmul.f32 %v3794_v32, %v3794_v32  ;;  %v3802_v37 = vpop.f32.mrb[9].mxu0  ;;  %v3804_v38 = vpop.f32.mrb[9].mxu1 }
 0x107   :  { %v422_v43 = vadd.f32 %v421_v24, %v3802_v37  ;;  %v479_v44 = vmul.f32 %v3802_v37, %v3802_v37  ;;  %v448_v45 = vadd.f32 %v447_v26, %v3804_v38  ;;  %v481_v46 = vmul.f32 %v3804_v38, %v3804_v38  ;;  %v3812_v49 = vpop.f32.mrb[10].mxu0  ;;  %v3814_v50 = vpop.f32.mrb[10].mxu1 }
 0x108   :  { %v497_v51 = vadd.f32 %v496_v23, %v478_v34  ;;  %v523_v52 = vadd.f32 %v522_v27, %v480_v36  ;;  %v410_v55 = vadd.f32 %v409_v33, %v3812_v49  ;;  %v482_v56 = vmul.f32 %v3812_v49, %v3812_v49  ;;  %v3819_v57 = vpop.f32.mrb[11].mxu0  ;;  %v3821_v58 = vpop.f32.mrb[11].mxu1 }
 0x109   :  { %v510_v59 = vadd.f32 %v509_v29, %v479_v44  ;;  %v536_v60 = vadd.f32 %v535_v30, %v481_v46  ;;  %v436_v61 = vadd.f32 %v435_v35, %v3814_v50  ;;  %v484_v62 = vmul.f32 %v3814_v50, %v3814_v50 }
 0x10a   :  { %v498_v1 = vadd.f32 %v497_v51, %v482_v56  ;;  %v423_v2 = vadd.f32 %v422_v43, %v3819_v57  ;;  %v483_v3 = vmul.f32 %v3819_v57, %v3819_v57  ;;  %v449_v4 = vadd.f32 %v448_v45, %v3821_v58 }
 0x10b   :  { %v524_v7 = vadd.f32 %v523_v52, %v484_v62  ;;  %v485_v8 = vmul.f32 %v3821_v58, %v3821_v58 }
 0x10c   :  { %v511_v9 = vadd.f32 %v510_v59, %v483_v3 }
 0x10d   :  { %v537_v10 = vadd.f32 %v536_v60, %v485_v8  ;;  %v3832_v13 = vpop.f32.mrb[12].mxu0  ;;  %v3834_v14 = vpop.f32.mrb[12].mxu1 }
 0x10e   :  { %v411_v15 = vadd.f32 %v410_v55, %v3832_v13  ;;  %v486_v16 = vmul.f32 %v3832_v13, %v3832_v13  ;;  %v437_v19 = vadd.f32 %v436_v61, %v3834_v14  ;;  %v488_v20 = vmul.f32 %v3834_v14, %v3834_v14  ;;  %v3842_v21 = vpop.f32.mrb[13].mxu0  ;;  %v3844_v22 = vpop.f32.mrb[13].mxu1 }
 0x10f   :  { %v424_v23 = vadd.f32 %v423_v2, %v3842_v21  ;;  %v487_v24 = vmul.f32 %v3842_v21, %v3842_v21  ;;  %v450_v25 = vadd.f32 %v449_v4, %v3844_v22  ;;  %v489_v26 = vmul.f32 %v3844_v22, %v3844_v22  ;;  %v3852_v27 = vpop.f32.mrb[14].mxu0  ;;  %v3854_v28 = vpop.f32.mrb[14].mxu1 }
 0x110   :  { %4676 = vst [vmem:[#allocation6_spill] sm:$0xff] %v3854_v28  ;;  %v499_v29 = vadd.f32 %v498_v1, %v486_v16  ;;  %v525_v30 = vadd.f32 %v524_v7, %v488_v20  ;;  %v412_v33 = vadd.f32 %v411_v15, %v3852_v27  ;;  %v490_v34 = vmul.f32 %v3852_v27, %v3852_v27  ;;  %v3859_v35 = vpop.f32.mrb[15].mxu0  ;;  %v3861_v36 = vpop.f32.mrb[15].mxu1 }
 0x111   :  { %v512_v43 = vadd.f32 %v511_v9, %v487_v24  ;;  %v538_v44 = vadd.f32 %v537_v10, %v489_v26  ;;  %v438_v45 = vadd.f32 %v437_v19, %v3854_v28  ;;  %v492_v46 = vmul.f32 %v3854_v28, %v3854_v28 }
 0x112   :  { %v413_v51 = vrot.slane %v412_v33, 4  ;;  %v500_v52 = vadd.f32 %v499_v29, %v490_v34  ;;  %v425_v55 = vadd.f32 %v424_v23, %v3859_v35  ;;  %v491_v56 = vmul.f32 %v3859_v35, %v3859_v35 }
 0x113   :  { %v439_v59 = vrot.slane %v438_v45, 4  ;;  %v526_v60 = vadd.f32 %v525_v30, %v492_v46  ;;  %v451_v61 = vadd.f32 %v450_v25, %v3861_v36  ;;  %v493_v62 = vmul.f32 %v3861_v36, %v3861_v36 }
 0x114   :  { %v414_v1 = vadd.f32 %v413_v51, %v412_v33  ;;  %v501_v2 = vrot.slane %v500_v52, 4  ;;  %v426_v3 = vrot.slane %v425_v55, 4  ;;  %v513_v4 = vadd.f32 %v512_v43, %v491_v56 }
 0x115   :  { %v440_v7 = vadd.f32 %v439_v59, %v438_v45  ;;  %v527_v8 = vrot.slane %v526_v60, 4  ;;  %v452_v9 = vrot.slane %v451_v61, 4  ;;  %v539_v10 = vadd.f32 %v538_v44, %v493_v62 }
 0x116   :  { %v415_v15 = vrot.slane %v414_v1, 2  ;;  %v502_v16 = vadd.f32 %v501_v2, %v500_v52  ;;  %v427_v19 = vadd.f32 %v426_v3, %v425_v55  ;;  %v514_v20 = vrot.slane %v513_v4, 4 }
 0x117   :  { %v441_v23 = vrot.slane %v440_v7, 2  ;;  %v528_v24 = vadd.f32 %v527_v8, %v526_v60  ;;  %v453_v26 = vadd.f32 %v452_v9, %v451_v61  ;;  %v540_v29 = vrot.slane %v539_v10, 4 }
 0x118   :  { %v416_v25 = vadd.f32 %v415_v15, %v414_v1  ;;  %v503_v30 = vrot.slane %v502_v16, 2  ;;  %v428_v34 = vrot.slane %v427_v19, 2  ;;  %v515_v46 = vadd.f32 %v514_v20, %v513_v4 }
 0x119   :  { %v442_v33 = vadd.f32 %v441_v23, %v440_v7  ;;  %v529_v51 = vrot.slane %v528_v24, 2  ;;  %v454_v28 = vrot.slane %v453_v26, 2  ;;  %v541_v43 = vadd.f32 %v540_v29, %v539_v10 }
 0x11a   :  { %v417_v45 = vrot.slane %v416_v25, 1  ;;  %v504_v56 = vadd.f32 %v503_v30, %v502_v16  ;;  %v429_v59 = vadd.f32 %v428_v34, %v427_v19  ;;  %v516_v44 = vrot.slane %v515_v46, 2 }
 0x11b   :  { %v443_v62 = vrot.slane %v442_v33, 1  ;;  %v530_v52 = vadd.f32 %v529_v51, %v528_v24  ;;  %v455_v55 = vadd.f32 %v454_v28, %v453_v26  ;;  %v542_v2 = vrot.slane %v541_v43, 2 }
 0x11c   :  { %v418_v3 = vadd.f32 %v417_v45, %v416_v25  ;;  %v505_v60 = vrot.slane %v504_v56, 1  ;;  %v430_v61 = vrot.slane %v429_v59, 1  ;;  %v517_v8 = vadd.f32 %v516_v44, %v515_v46 }
 0x11d   :  { %v444_v1 = vadd.f32 %v443_v62, %v442_v33  ;;  %v531_v9 = vrot.slane %v530_v52, 1  ;;  %v456_v15 = vrot.slane %v455_v55, 1  ;;  %v543_v4 = vadd.f32 %v542_v2, %v541_v43 }
 0x11e   :  { %v458_v7 = vmul.f32 0.015625, %v418_v3  ;;  %v506_v20 = vadd.f32 %v505_v60, %v504_v56  ;;  %v431_v23 = vadd.f32 %v430_v61, %v429_v59  ;;  %v518_v10 = vrot.slane %v517_v8, 1 }
 0x11f   :  { %v460_v29 = vmul.f32 0.015625, %v444_v1  ;;  %v532_v16 = vadd.f32 %v531_v9, %v530_v52  ;;  %v457_v19 = vadd.f32 %v456_v15, %v455_v55  ;;  %v544_v30 = vrot.slane %v543_v4, 1 }
 0x120   :  { %v546_v34 = vmul.f32 0.015625, %v506_v20  ;;  %v550_v24 = vmul.f32 %v458_v7, %v458_v7  ;;  %v459_v28 = vmul.f32 0.015625, %v431_v23  ;;  %v519_v26 = vadd.f32 %v518_v10, %v517_v8 }
 0x121   :  { %v548_v25 = vmul.f32 0.015625, %v532_v16  ;;  %v552_v51 = vmul.f32 %v460_v29, %v460_v29  ;;  %v461_v45 = vmul.f32 0.015625, %v457_v19  ;;  %v545_v46 = vadd.f32 %v544_v30, %v543_v4 }
 0x122   :  { %v554_v33 = vsub.f32 %v546_v34, %v550_v24  ;;  %v547_v44 = vmul.f32 0.015625, %v519_v26  ;;  %v551_v62 = vmul.f32 %v459_v28, %v459_v28  ;;  %v3344_v4 = vmov 1966171168  }
 0x123   :  { %v556_v43 = vsub.f32 %v548_v25, %v552_v51  ;;  %v549_v2 = vmul.f32 0.015625, %v545_v46  ;;  %v553_v56 = vmul.f32 %v461_v45, %v461_v45  ;;  %v577_v20 = vunpack.c.l.s4 %v3344_v4 }
 0x124   :  { %v558_v59 = vmax.f32 %v554_v33, 0.0  ;;  %v555_v3 = vsub.f32 %v547_v44, %v551_v62  ;;  %v579_v23 = vlaneseq  ;;  %v404_v62 = vld [vmem:[%s4661_s2] sm:$0xf] }
 0x125   :  { %v560_v60 = vmax.f32 %v556_v43, 0.0  ;;  %v557_v52 = vsub.f32 %v549_v2, %v553_v56  ;;  %v578_v10 = vunpack.c.0.s8 %v577_v20 }
 0x126   :  { %v562_v55 = vadd.f32 1e-05, %v558_v59  ;;  %v559_v61 = vmax.f32 %v555_v3, 0.0  ;;  %v580_v16 = vshrl.u32 %v579_v23, 7 }
 0x127   :  { %v564_v1 = vadd.f32 1e-05, %v560_v60  ;;  %v561_v9 = vmax.f32 %v557_v52, 0.0 }
 0x128   :  { %3303 = vrsqrt.f32 %v562_v55  ;;  %v563_v8 = vadd.f32 1e-05, %v559_v61  ;;  %v3872_v34 = vsub.s32 %v578_v10, %v580_v16  ;;  %v3879_v43 = vsub.s32 0, %v580_v16 }
 0x129   :  { %3305 = vrsqrt.f32 %v564_v1  ;;  %v565_v15 = vadd.f32 1e-05, %v561_v9  ;;  %v3882_v56 = vsub.s32 1, %v580_v16  ;;  %v3884_v59 = vsub.s32 2, %v580_v16 }
 0x12a   :  { %3307 = vrsqrt.f32 %v563_v8  ;;  %v3886_v3 = vsub.s32 3, %v580_v16 }
 0x12b   :  { %3309 = vrsqrt.f32 %v565_v15 }
 0x132   :  { %v3304_v19 = vpop.eup %3303 }
 0x133   :  { %v3306_v30 = vpop.eup %3305 }
 0x134   :  { %v3308_v24 = vpop.eup %3307 }
 0x135   :  { %v3310_v26 = vpop.eup %3309  ;;  %v574_v25 = vcombine.low %v3304_v19, %v3308_v24 }
 0x136   :  { %v575_v51 = vcombine.low %v3306_v30, %v3310_v26 }
 0x137   :  { %v582_v46 = vrot.slane %v574_v25, %v3872_v34 }
 0x138   :  { %v589_v33 = vrot.slane %v575_v51, %v3872_v34 }
 0x13a   :  { %v590_v44 = vcombine.low %v582_v46, %v589_v33 }
 0x13c   :  { %v597_v2 = vrot.slane %v590_v44, %v3872_v34 }
 0x13e   :  { %v599_v60 = vmul.f32 %v597_v2, %v404_v62 }
 0x140   :  { %v604_v52 = vrot.slane %v599_v60, %v3879_v43  ;;  %v608_v55 = vrot.slane %v599_v60, %v3882_v56  ;;  %v612_v61 = vrot.slane %v599_v60, %v3884_v59  ;;  %v616_v1 = vrot.slane %v599_v60, %v3886_v3 }
 0x142   :  { %v621_v9 = vmul.f32 %v604_v52, %v458_v7  ;;  %v622_v8 = vmul.f32 %v608_v55, %v459_v28  ;;  %v623_v15 = vmul.f32 %v612_v61, %v460_v29  ;;  %v624_v4 = vmul.f32 %v616_v1, %v461_v45 }
 0x143   :  { %v686_v20 = vmul.f32 %v616_v1, %v3861_v36  ;;  %v656_v23 = vmul.f32 %v608_v55, %v3716_v41  ;;  %v660_v10 = vmul.f32 %v608_v55, %v3740_v53  ;;  %v655_v16 = vmul.f32 %v604_v52, %v3712_v39 }
 0x144   :  { %v629_v19 = vcombine.low %v621_v9, %v622_v8  ;;  %v630_v30 = vcombine.low %v623_v15, %v624_v4  ;;  %v659_v24 = vmul.f32 %v604_v52, %v3728_v47  ;;  %v664_v26 = vmul.f32 %v608_v55, %v3762_v5 }
 0x145   :  { %v668_v25 = vmul.f32 %v608_v55, %v3779_v17  ;;  %v663_v7 = vmul.f32 %v604_v52, %v3752_v63  ;;  %v667_v29 = vmul.f32 %v604_v52, %v3772_v11  ;;  %v672_v36 = vmul.f32 %v608_v55, %v3802_v37 }
 0x146   :  { %v637_v41 = vrot.slane %v629_v19, %v3872_v34  ;;  %v644_v53 = vrot.slane %v630_v30, %v3872_v34  ;;  %v676_v39 = vmul.f32 %v608_v55, %v3819_v57  ;;  %v671_v28 = vmul.f32 %v604_v52, %v3792_v31  ;;  %v405_v31 = vld [vmem:[%s4662_s3] sm:$0xf] }
 0x147   :  { %v675_v47 = vmul.f32 %v604_v52, %v3812_v49  ;;  %v680_v5 = vmul.f32 %v608_v55, %v3842_v21  ;;  %v3909_v17 = vmul.f32 %v608_v55, %v3859_v35  ;;  %v3912_v63 = vmul.f32 %v604_v52, %v3832_v13 }
 0x148   :  { %v645_v11 = vcombine.low %v637_v41, %v644_v53  ;;  %v3915_v37 = vmul.f32 %v604_v52, %v3852_v27  ;;  %v3918_v45 = vmul.f32 %v616_v1, %v3718_v42  ;;  %v3921_v57 = vmul.f32 %v616_v1, %v3742_v54  ;;  %v3183_v53 = vld [vmem:[%s4663_s4 + $0x224] ss:$16 sps:$4 sm:$0xff]  }
 0x149   :  { %v3927_v49 = vmul.f32 %v612_v61, %v3714_v40  ;;  %v3930_v13 = vmul.f32 %v612_v61, %v3730_v48  ;;  %v3933_v21 = vmul.f32 %v616_v1, %v3764_v6  ;;  %v3936_v27 = vmul.f32 %v616_v1, %v3781_v18 }
 0x14a   :  { %v652_v42 = vrot.slane %v645_v11, %v3872_v34  ;;  %v3940_v54 = vmul.f32 %v612_v61, %v3754_v0  ;;  %v3943_v35 = vmul.f32 %v612_v61, %v3774_v12  ;;  %v3946_v40 = vmul.f32 %v616_v1, %v3804_v38  ;;  %v4677_v12 = vld [vmem:[#allocation6_spill] sm:$0xff]  ;;  %v3186_v11 = vld [vmem:[%s4663_s4 + $0x22c] ss:$16 sps:$4 sm:$0xff]  }
 0x14b   :  { %v3949_v48 = vmul.f32 %v616_v1, %v3821_v58  ;;  %v3952_v6 = vmul.f32 %v612_v61, %v3794_v32  ;;  %v3955_v18 = vmul.f32 %v612_v61, %v3814_v50  ;;  %v3958_v51 = vmul.f32 %v616_v1, %v3844_v22 }
 0x14c   :  { %v654_v0 = vsub.f32 %v405_v31, %v652_v42  ;;  %v3961_v46 = vmul.f32 %v612_v61, %v3834_v14  ;;  %v3964_v33 = vmul.f32 %v612_v61, %v4677_v12 }
 0x14e   :  { %v691_v38 = vrot.slane %v654_v0, %v3879_v43  ;;  %v695_v58 = vrot.slane %v654_v0, %v3882_v56  ;;  %v3969_v32 = vrot.slane %v654_v0, %v3886_v3  ;;  %v3972_v50 = vrot.slane %v654_v0, %v3884_v59 }
 0x150   :  { %v3975_v22 = vadd.f32 %v3969_v32, %v686_v20  ;;  %v709_v44 = vadd.f32 %v695_v58, %v656_v23  ;;  %v713_v62 = vadd.f32 %v695_v58, %v660_v10  ;;  %v708_v14 = vadd.f32 %v691_v38, %v655_v16  ;;  %v3175_v20 = vld [vmem:[%s4663_s4 + $0x200] ss:$16 sps:$4 sm:$0xff]   ;;  %v3178_v23 = vld [vmem:[%s4663_s4 + $0x208] ss:$16 sps:$4 sm:$0xff]  }
 0x151   :  { %v712_v2 = vadd.f32 %v691_v38, %v659_v24  ;;  %v717_v60 = vadd.f32 %v695_v58, %v664_v26  ;;  %v721_v52 = vadd.f32 %v695_v58, %v668_v25  ;;  %v716_v55 = vadd.f32 %v691_v38, %v663_v7 }
 0x152   :  { %v741_v61 = vmax.f32 %v709_v44, 0.0  ;;  %v745_v1 = vmax.f32 %v713_v62, 0.0  ;;  %v740_v9 = vmax.f32 %v708_v14, 0.0  ;;  %v720_v8 = vadd.f32 %v691_v38, %v667_v29  ;;  %v3181_v44 = vld [vmem:[%s4663_s4 + $0x220] ss:$16 sps:$4 sm:$0xff]  }
 0x153   :  { %v744_v15 = vmax.f32 %v712_v2, 0.0  ;;  %v749_v4 = vmax.f32 %v717_v60, 0.0  ;;  %v753_v19 = vmax.f32 %v721_v52, 0.0  ;;  %v748_v30 = vmax.f32 %v716_v55, 0.0  ;;  %v3184_v62 = vld [vmem:[%s4663_s4 + $0x228] ss:$16 sps:$4 sm:$0xff]  }
 0x154   :  { %v773_v41 = vpack.c.bf16 %v745_v1, %v741_v61  ;;  %v752_v10 = vmax.f32 %v720_v8, 0.0  ;;  %v725_v16 = vadd.f32 %v695_v58, %v672_v36  ;;  %v729_v24 = vadd.f32 %v695_v58, %v676_v39 }
 0x155   :  { %v772_v26 = vpack.c.bf16 %v744_v15, %v740_v9  ;;  %v777_v25 = vpack.c.bf16 %v753_v19, %v749_v4  ;;  %v724_v7 = vadd.f32 %v691_v38, %v671_v28  ;;  %v728_v29 = vadd.f32 %v691_v38, %v675_v47 }
 0x156   :  { %1620 = vmatprep.mubr.bf16.mxu0 %v773_v41  ;;  %1766 = vmatprep.mubr.bf16.mxu1 %v773_v41  ;;  %v776_v31 = vpack.c.bf16 %v752_v10, %v748_v30  ;;  %v757_v42 = vmax.f32 %v725_v16, 0.0  ;;  %v761_v0 = vmax.f32 %v729_v24, 0.0  ;;  %v733_v12 = vadd.f32 %v695_v58, %v680_v5  ;;  %v3195_v10 = vld [vmem:[%s4663_s4 + $0x264] ss:$16 sps:$4 sm:$0xff]   ;;  %v3198_v16 = vld [vmem:[%s4663_s4 + $0x26c] ss:$16 sps:$4 sm:$0xff]  }
 0x157   :  { %1621 = vmatmul.mubr.bf16.vlgmr.msra.gmra.mrb[16].mxu0 %v772_v26  ;;  %1767 = vmatmul.mubr.bf16.vlgmr.msra.gmra.mrb[16].mxu1 %v772_v26  ;;  %v756_v36 = vmax.f32 %v724_v7, 0.0  ;;  %v760_v39 = vmax.f32 %v728_v29, 0.0  ;;  %v737_v28 = vadd.f32 %v695_v58, %v3909_v17  ;;  %v732_v47 = vadd.f32 %v691_v38, %v3912_v63  ;;  %v3189_v17 = vld [vmem:[%s4663_s4 + $0x244] ss:$16 sps:$4 sm:$0xff]   ;;  %v3192_v63 = vld [vmem:[%s4663_s4 + $0x24c] ss:$16 sps:$4 sm:$0xff]  }
 0x158   :  { %1662 = vmatpush1.bf16.msra.mxu0 %v3175_v20  ;;  %1808 = vmatpush1.bf16.msra.mxu1 %v3178_v23  ;;  %v781_v14 = vpack.c.bf16 %v761_v0, %v757_v42  ;;  %v765_v5 = vmax.f32 %v733_v12, 0.0  ;;  %v736_v2 = vadd.f32 %v691_v38, %v3915_v37  ;;  %v711_v60 = vadd.f32 %v3969_v32, %v3918_v45 }
 0x159   :  { %1630 = vmatprep.mubr.bf16.mxu0 %v777_v25  ;;  %1776 = vmatprep.mubr.bf16.mxu1 %v777_v25  ;;  %v4006_v58 = vpack.c.bf16 %v760_v39, %v756_v36  ;;  %v769_v52 = vmax.f32 %v737_v28, 0.0  ;;  %v764_v55 = vmax.f32 %v732_v47, 0.0  ;;  %v715_v37 = vadd.f32 %v3969_v32, %v3921_v57  ;;  %v3187_v57 = vld [vmem:[%s4663_s4 + $0x240] ss:$16 sps:$4 sm:$0xff]  }
 0x15a   :  { %1663 = vmatprep.subr.bf16.mxu0 %v3183_v53  ;;  %1809 = vmatprep.subr.bf16.mxu1 %v3186_v11  ;;  %v768_v45 = vmax.f32 %v736_v2, 0.0  ;;  %v743_v38 = vmax.f32 %v711_v60, 0.0  ;;  %v710_v61 = vadd.f32 %v3972_v50, %v3927_v49  ;;  %v714_v1 = vadd.f32 %v3972_v50, %v3930_v13  ;;  %v3190_v49 = vld [vmem:[%s4663_s4 + $0x248] ss:$16 sps:$4 sm:$0xff]   ;;  %v3205_v60 = vld [vmem:[%s4663_s4 + $0x2a0] ss:$16 sps:$4 sm:$0xff]  }
 0x15b   :  { %v4014_v9 = vpack.c.bf16 %v769_v52, %v765_v5  ;;  %v747_v8 = vmax.f32 %v715_v37, 0.0  ;;  %v719_v15 = vadd.f32 %v3969_v32, %v3933_v21  ;;  %v723_v4 = vadd.f32 %v3969_v32, %v3936_v27  ;;  %v3211_v52 = vld [vmem:[%s4663_s4 + $0x2c0] ss:$16 sps:$4 sm:$0xff]   ;;  %v3219_v37 = vld [vmem:[%s4663_s4 + $0x2e4] ss:$16 sps:$4 sm:$0xff]  }
 0x15c   :  { %1664 = vmatpush1.bf16.msra.mxu0 %v3181_v44  ;;  %1810 = vmatpush1.bf16.msra.mxu1 %v3184_v62  ;;  %v4026_v13 = vpack.c.bf16 %v768_v45, %v764_v55  ;;  %v742_v19 = vmax.f32 %v710_v61, 0.0  ;;  %v746_v30 = vmax.f32 %v714_v1, 0.0  ;;  %v718_v21 = vadd.f32 %v3972_v50, %v3940_v54  ;;  %v3199_v62 = vld [vmem:[%s4663_s4 + $0x280] ss:$16 sps:$4 sm:$0xff]   ;;  %v3214_v55 = vld [vmem:[%s4663_s4 + $0x2c8] ss:$16 sps:$4 sm:$0xff]  }
 0x15d   :  { %1665 = vmatprep.subr.bf16.mxu0 %v3189_v17  ;;  %1811 = vmatprep.subr.bf16.mxu1 %v3192_v63  ;;  %v4030_v27 = vpack.c.bf16 %v747_v8, %v743_v38  ;;  %v751_v41 = vmax.f32 %v719_v15, 0.0  ;;  %v755_v20 = vmax.f32 %v723_v4, 0.0  ;;  %v722_v23 = vadd.f32 %v3972_v50, %v3943_v35  ;;  %v3193_v35 = vld [vmem:[%s4663_s4 + $0x260] ss:$16 sps:$4 sm:$0xff]   ;;  %v3208_v17 = vld [vmem:[%s4663_s4 + $0x2a8] ss:$16 sps:$4 sm:$0xff]  }
 0x15e   :  { %v4040_v24 = vpack.c.bf16 %v746_v30, %v742_v19  ;;  %v750_v54 = vmax.f32 %v718_v21, 0.0  ;;  %v727_v26 = vadd.f32 %v3969_v32, %v3946_v40  ;;  %v731_v25 = vadd.f32 %v3969_v32, %v3949_v48  ;;  %v3196_v40 = vld [vmem:[%s4663_s4 + $0x268] ss:$16 sps:$4 sm:$0xff]   ;;  %v3213_v63 = vld [vmem:[%s4663_s4 + $0x2c4] ss:$16 sps:$4 sm:$0xff]  }
 0x15f   :  { %1631 = vmatmul.mubr.bf16.gmra.mrb[20].mxu0 %v776_v31  ;;  %1777 = vmatmul.mubr.bf16.gmra.mrb[20].mxu1 %v776_v31  ;;  %v4049_v7 = vpack.c.bf16 %v755_v20, %v751_v41  ;;  %v754_v29 = vmax.f32 %v722_v23, 0.0  ;;  %v726_v53 = vadd.f32 %v3972_v50, %v3952_v6  ;;  %v730_v11 = vadd.f32 %v3972_v50, %v3955_v18  ;;  %v3201_v6 = vld [vmem:[%s4663_s4 + $0x284] ss:$16 sps:$4 sm:$0xff]   ;;  %v3204_v18 = vld [vmem:[%s4663_s4 + $0x28c] ss:$16 sps:$4 sm:$0xff]  }
 0x160   :  { %1666 = vmatpush1.bf16.msra.mxu0 %v3187_v57  ;;  %1812 = vmatpush1.bf16.msra.mxu1 %v3190_v49  ;;  %v759_v48 = vmax.f32 %v727_v26, 0.0  ;;  %v763_v31 = vmax.f32 %v731_v25, 0.0  ;;  %v735_v42 = vadd.f32 %v3969_v32, %v3958_v51  ;;  %v771_v0 = vmax.f32 %v3975_v22, 0.0  ;;  %v3222_v45 = vld [vmem:[%s4663_s4 + $0x2ec] ss:$16 sps:$4 sm:$0xff]  }
 0x161   :  { %1640 = vmatprep.mubr.bf16.mxu0 %v781_v14  ;;  %1786 = vmatprep.mubr.bf16.mxu1 %v781_v14  ;;  %v4067_v12 = vpack.c.bf16 %v754_v29, %v750_v54  ;;  %v758_v36 = vmax.f32 %v726_v53, 0.0  ;;  %v762_v39 = vmax.f32 %v730_v11, 0.0  ;;  %v734_v28 = vadd.f32 %v3972_v50, %v3961_v46  ;;  %v3202_v46 = vld [vmem:[%s4663_s4 + $0x288] ss:$16 sps:$4 sm:$0xff]   ;;  %v3217_v38 = vld [vmem:[%s4663_s4 + $0x2e0] ss:$16 sps:$4 sm:$0xff]  }
 0x162   :  { %1667 = vmatprep.subr.bf16.mxu0 %v3195_v10  ;;  %1813 = vmatprep.subr.bf16.mxu1 %v3198_v16  ;;  %v4071_v51 = vpack.c.bf16 %v763_v31, %v759_v48  ;;  %v767_v32 = vmax.f32 %v735_v42, 0.0  ;;  %v738_v22 = vadd.f32 %v3972_v50, %v3964_v33  ;;  %v3207_v33 = vld [vmem:[%s4663_s4 + $0x2a4] ss:$16 sps:$4 sm:$0xff]   ;;  %v3210_v50 = vld [vmem:[%s4663_s4 + $0x2ac] ss:$16 sps:$4 sm:$0xff]  }
 0x163   :  { %v4075_v47 = vpack.c.bf16 %v762_v39, %v758_v36  ;;  %v766_v44 = vmax.f32 %v734_v28, 0.0  ;;  %v3220_v61 = vld [vmem:[%s4663_s4 + $0x2e8] ss:$16 sps:$4 sm:$0xff]   ;;  %v3225_v1 = vld [vmem:[%s4663_s4 + $0x304] ss:$16 sps:$4 sm:$0xff]  }
 0x164   :  { %1668 = vmatpush1.bf16.msra.mxu0 %v3193_v35  ;;  %1814 = vmatpush1.bf16.msra.mxu1 %v3196_v40  ;;  %v4083_v14 = vpack.c.bf16 %v771_v0, %v767_v32  ;;  %v770_v5 = vmax.f32 %v738_v22, 0.0  ;;  %v3223_v8 = vld [vmem:[%s4663_s4 + $0x300] ss:$16 sps:$4 sm:$0xff]   ;;  %v3226_v15 = vld [vmem:[%s4663_s4 + $0x308] ss:$16 sps:$4 sm:$0xff]  }
 0x165   :  { %1669 = vmatprep.subr.bf16.mxu0 %v3201_v6  ;;  %1815 = vmatprep.subr.bf16.mxu1 %v3204_v18  ;;  %v3231_v4 = vld [vmem:[%s4663_s4 + $0x324] ss:$16 sps:$4 sm:$0xff]   ;;  %v3234_v57 = vld [vmem:[%s4663_s4 + $0x32c] ss:$16 sps:$4 sm:$0xff]   ;;  %v3229_v49 = vld [vmem:[%s4663_s4 + $0x320] ss:$16 sps:$4 sm:$0xff]  }
 0x166   :  { %v4091_v2 = vpack.c.bf16 %v770_v5, %v766_v44  ;;  %v3237_v19 = vld [vmem:[%s4663_s4 + $0x344] ss:$16 sps:$4 sm:$0xff]   ;;  %v3240_v30 = vld [vmem:[%s4663_s4 + $0x34c] ss:$16 sps:$4 sm:$0xff]   ;;  %v3235_v21 = vld [vmem:[%s4663_s4 + $0x340] ss:$16 sps:$4 sm:$0xff]  }
 0x167   :  { %1641 = vmatmul.mubr.bf16.gmra.mrb[24].mxu0 %v4006_v58  ;;  %1787 = vmatmul.mubr.bf16.gmra.mrb[24].mxu1 %v4006_v58  ;;  %v3216_v58 = vld [vmem:[%s4663_s4 + $0x2cc] ss:$16 sps:$4 sm:$0xff]   ;;  %v3243_v41 = vld [vmem:[%s4663_s4 + $0x364] ss:$16 sps:$4 sm:$0xff]   ;;  %v3241_v23 = vld [vmem:[%s4663_s4 + $0x360] ss:$16 sps:$4 sm:$0xff]  }
 0x168   :  { %1670 = vmatpush1.bf16.msra.mxu0 %v3199_v62  ;;  %1816 = vmatpush1.bf16.msra.mxu1 %v3202_v46  ;;  %v3246_v20 = vld [vmem:[%s4663_s4 + $0x36c] ss:$16 sps:$4 sm:$0xff]   ;;  %v3244_v10 = vld [vmem:[%s4663_s4 + $0x368] ss:$16 sps:$4 sm:$0xff]   ;;  %v3249_v16 = vld [vmem:[%s4663_s4 + $0x384] ss:$16 sps:$4 sm:$0xff]  }
 0x169   :  { %1650 = vmatprep.mubr.bf16.mxu0 %v4014_v9  ;;  %1796 = vmatprep.mubr.bf16.mxu1 %v4014_v9  ;;  %v3228_v9 = vld [vmem:[%s4663_s4 + $0x30c] ss:$16 sps:$4 sm:$0xff]   ;;  %v3247_v26 = vld [vmem:[%s4663_s4 + $0x380] ss:$16 sps:$4 sm:$0xff]   ;;  %v3250_v25 = vld [vmem:[%s4663_s4 + $0x388] ss:$16 sps:$4 sm:$0xff]  }
 0x16a   :  { %1671 = vmatprep.subr.bf16.mxu0 %v3207_v33  ;;  %1817 = vmatprep.subr.bf16.mxu1 %v3210_v50  ;;  %v3252_v54 = vld [vmem:[%s4663_s4 + $0x38c] ss:$16 sps:$4 sm:$0xff]   ;;  %v3255_v35 = vld [vmem:[%s4663_s4 + $0x3a4] ss:$16 sps:$4 sm:$0xff]   ;;  %v3253_v53 = vld [vmem:[%s4663_s4 + $0x3a0] ss:$16 sps:$4 sm:$0xff]  }
 0x16b   :  { %v3258_v29 = vld [vmem:[%s4663_s4 + $0x3ac] ss:$16 sps:$4 sm:$0xff]   ;;  %v3256_v11 = vld [vmem:[%s4663_s4 + $0x3a8] ss:$16 sps:$4 sm:$0xff]   ;;  %v3261_v40 = vld [vmem:[%s4663_s4 + $0x3c4] ss:$16 sps:$4 sm:$0xff]  }
 0x16c   :  { %1672 = vmatpush1.bf16.msra.mxu0 %v3205_v60  ;;  %1818 = vmatpush1.bf16.msra.mxu1 %v3208_v17  ;;  %v3264_v48 = vld [vmem:[%s4663_s4 + $0x3cc] ss:$16 sps:$4 sm:$0xff]   ;;  %v3259_v31 = vld [vmem:[%s4663_s4 + $0x3c0] ss:$16 sps:$4 sm:$0xff]   ;;  %v3262_v42 = vld [vmem:[%s4663_s4 + $0x3c8] ss:$16 sps:$4 sm:$0xff]  }
 0x16d   :  { %1673 = vmatprep.subr.bf16.mxu0 %v3213_v63  ;;  %1819 = vmatprep.subr.bf16.mxu1 %v3216_v58  ;;  %v3267_v0 = vld [vmem:[%s4663_s4 + $0x3e4] ss:$16 sps:$4 sm:$0xff]   ;;  %v3270_v6 = vld [vmem:[%s4663_s4 + $0x3ec] ss:$16 sps:$4 sm:$0xff]   ;;  %v3265_v18 = vld [vmem:[%s4663_s4 + $0x3e0] ss:$16 sps:$4 sm:$0xff]  }
 0x16e   :  { %v3268_v36 = vld [vmem:[%s4663_s4 + $0x3e8] ss:$16 sps:$4 sm:$0xff]   ;;  %v3274_v39 = vld [vmem:[%s4666_s7 + $0x80] sm:$0xff]   ;;  %v3281_v44 = vld [vmem:[%s4666_s7 + $0xd0] sm:$0xff]  }
 0x16f   :  { %1651 = vmatmul.mubr.bf16.gmra.mrb[28].mxu0 %v4026_v13  ;;  %1797 = vmatmul.mubr.bf16.gmra.mrb[28].mxu1 %v4026_v13  ;;  %v3232_v13 = vld [vmem:[%s4663_s4 + $0x328] ss:$16 sps:$4 sm:$0xff]   ;;  %v3280_v62 = vld [vmem:[%s4666_s7 + $0x10] sm:$0xff]   ;;  %v3289_v60 = vld [vmem:[%s4666_s7 + $0xe0] sm:$0xff]  }
 0x170   :  { %1674 = vmatpush1.bf16.msra.mxu0 %v3211_v52  ;;  %1820 = vmatpush1.bf16.msra.mxu1 %v3214_v55  ;;  %v3275_v28 = vld [vmem:[%s4666_s7 + $0x48] sm:$0xff]   ;;  %v3282_v46 = vld [vmem:[%s4666_s7 + $0x90] sm:$0xff]   ;;  %v3284_v5 = vld [vmem:[%s4666_s7 + $0x18] sm:$0xff]  }
 0x171   :  { %1693 = vmatprep.mubr.bf16.mxu0 %v4030_v27  ;;  %1839 = vmatprep.mubr.bf16.mxu1 %v4030_v27  ;;  %v3238_v27 = vld [vmem:[%s4663_s4 + $0x348] ss:$16 sps:$4 sm:$0xff]   ;;  %v3288_v17 = vld [vmem:[%s4666_s7 + $0x20] sm:$0xff]  }
 0x172   :  { %1675 = vmatprep.subr.bf16.mxu0 %v3219_v37  ;;  %1821 = vmatprep.subr.bf16.mxu1 %v3222_v45  ;;  %v3276_v32 = vld [vmem:[%s4666_s7 + $0x8] sm:$0xff]   ;;  %v3285_v33 = vld [vmem:[%s4666_s7 + $0xd8] sm:$0xff]   ;;  %v3290_v63 = vld [vmem:[%s4666_s7 + $0xa0] sm:$0xff]  }
 0x173   :  { %v3278_v22 = vld [vmem:[%s4666_s7 + $0x88] sm:$0xff]   ;;  %v3286_v50 = vld [vmem:[%s4666_s7 + $0x98] sm:$0xff]   ;;  %v3295_v45 = vld [vmem:[%s4666_s7 + $0x70] sm:$0xff]  }
 0x174   :  { %1676 = vmatpush1.bf16.msra.mxu0 %v3217_v38  ;;  %1822 = vmatpush1.bf16.msra.mxu1 %v3220_v61  ;;  %v3291_v58 = vld [vmem:[%s4666_s7 + $0x68] sm:$0xff]   ;;  %v3297_v38 = vld [vmem:[%s4666_s7 + $0xf0] sm:$0xff]  }
 0x175   :  { %1677 = vmatprep.subr.bf16.mxu0 %v3225_v1  ;;  %1823 = vmatprep.subr.bf16.mxu1 %v3228_v9  ;;  %v3293_v52 = vld [vmem:[%s4666_s7 + $0xe8] sm:$0xff]   ;;  %v3296_v61 = vld [vmem:[%s4666_s7 + $0x30] sm:$0xff]   ;;  %v3299_v9 = vld [vmem:[%s4666_s7 + $0x78] sm:$0xff]  }
 0x176   :  { %v3292_v55 = vld [vmem:[%s4666_s7 + $0x28] sm:$0xff]   ;;  %v3298_v1 = vld [vmem:[%s4666_s7 + $0xb0] sm:$0xff]  }
 0x177   :  { %v3294_v37 = vld [vmem:[%s4666_s7 + $0xa8] sm:$0xff]  }
 0x178   :  { %1678 = vmatpush1.bf16.msra.mxu0 %v3223_v8  ;;  %1824 = vmatpush1.bf16.msra.mxu1 %v3226_v15  ;;  %v3301_v8 = vld [vmem:[%s4666_s7 + $0xf8] sm:$0xff]  }
 0x179   :  { %1679 = vmatprep.subr.bf16.mxu0 %v3231_v4  ;;  %1825 = vmatprep.subr.bf16.mxu1 %v3234_v57  ;;  %v3300_v15 = vld [vmem:[%s4666_s7 + $0x38] sm:$0xff]  }
 0x17a   :  { %v3302_v4 = vld [vmem:[%s4666_s7 + $0xb8] sm:$0xff]  }
 0x17c   :  { %1680 = vmatpush1.bf16.msra.mxu0 %v3229_v49  ;;  %1826 = vmatpush1.bf16.msra.mxu1 %v3232_v13 }
 0x17d   :  { %1681 = vmatprep.subr.bf16.mxu0 %v3237_v19  ;;  %1827 = vmatprep.subr.bf16.mxu1 %v3240_v30 }
 0x180   :  { %1682 = vmatpush1.bf16.msra.mxu0 %v3235_v21  ;;  %1828 = vmatpush1.bf16.msra.mxu1 %v3238_v27 }
 0x181   :  { %1683 = vmatprep.subr.bf16.mxu0 %v3243_v41  ;;  %1829 = vmatprep.subr.bf16.mxu1 %v3246_v20 }
 0x184   :  { %1684 = vmatpush1.bf16.msra.mxu0 %v3241_v23  ;;  %1830 = vmatpush1.bf16.msra.mxu1 %v3244_v10 }
 0x185   :  { %1685 = vmatprep.subr.bf16.mxu0 %v3249_v16  ;;  %1831 = vmatprep.subr.bf16.mxu1 %v3252_v54 }
 0x188   :  { %1686 = vmatpush1.bf16.msra.mxu0 %v3247_v26  ;;  %1832 = vmatpush1.bf16.msra.mxu1 %v3250_v25 }
 0x189   :  { %1687 = vmatprep.subr.bf16.mxu0 %v3255_v35  ;;  %1833 = vmatprep.subr.bf16.mxu1 %v3258_v29 }
 0x18c   :  { %1688 = vmatpush1.bf16.msra.mxu0 %v3253_v53  ;;  %1834 = vmatpush1.bf16.msra.mxu1 %v3256_v11 }
 0x18d   :  { %1689 = vmatprep.subr.bf16.mxu0 %v3261_v40  ;;  %1835 = vmatprep.subr.bf16.mxu1 %v3264_v48 }
 0x190   :  { %1690 = vmatpush1.bf16.msra.mxu0 %v3259_v31  ;;  %1836 = vmatpush1.bf16.msra.mxu1 %v3262_v42 }
 0x191   :  { %1691 = vmatprep.subr.bf16.mxu0 %v3267_v0  ;;  %1837 = vmatprep.subr.bf16.mxu1 %v3270_v6 }
 0x194   :  { %1692 = vmatpush1.bf16.msra.mxu0 %v3265_v18  ;;  %1838 = vmatpush1.bf16.msra.mxu1 %v3268_v36 }
 0x197   :  { %1694 = vmatmul.mubr.bf16.vlgmr.msra.gmra.mrb[16].mxu0 %v4040_v24  ;;  %1840 = vmatmul.mubr.bf16.vlgmr.msra.gmra.mrb[16].mxu1 %v4040_v24  ;;  %v3271_v24 = vld [vmem:[%s4666_s7 + $0x40] sm:$0xff]  }
 0x198   :  { %1703 = vmatprep.mubr.bf16.mxu0 %v4049_v7  ;;  %1849 = vmatprep.mubr.bf16.mxu1 %v4049_v7  ;;  %v3273_v7 = vld [vmem:[%s4666_s7 + $0xc0] sm:$0xff]  }
 0x199   :  { %2910 = vmatprep.subr.bf16.mxu0 %v3271_v24  ;;  %2950 = vmatprep.subr.bf16.mxu1 %v3273_v7 }
 0x19a   :  { %2951 = vmatpush3.bf16.msra.mxu1 %v3274_v39 }
 0x19f   :  { %1704 = vmatmul.mubr.bf16.gmra.mrb[20].mxu0 %v4067_v12  ;;  %1850 = vmatmul.mubr.bf16.gmra.mrb[20].mxu1 %v4067_v12  ;;  %v3272_v12 = vld [vmem:[%s4666_s7] sm:$0xff]  }
 0x1a0   :  { %1713 = vmatprep.mubr.bf16.mxu0 %v4071_v51  ;;  %1859 = vmatprep.mubr.bf16.mxu1 %v4071_v51  ;;  %v3277_v51 = vld [vmem:[%s4666_s7 + $0xc8] sm:$0xff]  }
 0x1a1   :  { %2911 = vmatpush3.bf16.msra.mxu0 %v3272_v12  ;;  %2952 = vmatprep.subr.bf16.mxu1 %v3277_v51 }
 0x1a2   :  { %2912 = vmatprep.subr.bf16.mxu0 %v3275_v28  ;;  %2953 = vmatpush3.bf16.msra.mxu1 %v3278_v22 }
 0x1a3   :  { %2954 = vmatprep.subr.bf16.mxu1 %v3281_v44 }
 0x1a5   :  { %2913 = vmatpush3.bf16.msra.mxu0 %v3276_v32 }
 0x1a6   :  { %2955 = vmatpush3.bf16.msra.mxu1 %v3282_v46 }
 0x1a7   :  { %1714 = vmatmul.mubr.bf16.gmra.mrb[24].mxu0 %v4075_v47  ;;  %1860 = vmatmul.mubr.bf16.gmra.mrb[24].mxu1 %v4075_v47  ;;  %v3279_v47 = vld [vmem:[%s4666_s7 + $0x50] sm:$0xff]  }
 0x1a8   :  { %1723 = vmatprep.mubr.bf16.mxu0 %v4083_v14  ;;  %1869 = vmatprep.mubr.bf16.mxu1 %v4083_v14  ;;  %v3283_v14 = vld [vmem:[%s4666_s7 + $0x58] sm:$0xff]  }
 0x1a9   :  { %2914 = vmatprep.subr.bf16.mxu0 %v3279_v47  ;;  %2956 = vmatprep.subr.bf16.mxu1 %v3285_v33 }
 0x1aa   :  { %2915 = vmatpush3.bf16.msra.mxu0 %v3280_v62  ;;  %2957 = vmatpush3.bf16.msra.mxu1 %v3286_v50 }
 0x1ab   :  { %2916 = vmatprep.subr.bf16.mxu0 %v3283_v14  ;;  %2958 = vmatprep.subr.bf16.mxu1 %v3289_v60 }
 0x1ae   :  { %2917 = vmatpush3.bf16.msra.mxu0 %v3284_v5  ;;  %2959 = vmatpush3.bf16.msra.mxu1 %v3290_v63 }
 0x1af   :  { %1724 = vmatmul.mubr.bf16.gmra.mrb[28].mxu0 %v4091_v2  ;;  %1870 = vmatmul.mubr.bf16.gmra.mrb[28].mxu1 %v4091_v2  ;;  %v3287_v2 = vld [vmem:[%s4666_s7 + $0x60] sm:$0xff]  }
 0x1b0   :  { %2918 = vmatprep.subr.bf16.mxu0 %v3287_v2  ;;  %2960 = vmatprep.subr.bf16.mxu1 %v3293_v52 }
 0x1b2   :  { %2919 = vmatpush3.bf16.msra.mxu0 %v3288_v17  ;;  %2961 = vmatpush3.bf16.msra.mxu1 %v3294_v37 }
 0x1b3   :  { %2920 = vmatprep.subr.bf16.mxu0 %v3291_v58  ;;  %2962 = vmatprep.subr.bf16.mxu1 %v3297_v38 }
 0x1b6   :  { %2921 = vmatpush3.bf16.msra.mxu0 %v3292_v55  ;;  %2963 = vmatpush3.bf16.msra.mxu1 %v3298_v1 }
 0x1b7   :  { %2922 = vmatprep.subr.bf16.mxu0 %v3295_v45  ;;  %2964 = vmatprep.subr.bf16.mxu1 %v3301_v8 }
 0x1ba   :  { %2923 = vmatpush3.bf16.msra.mxu0 %v3296_v61  ;;  %2965 = vmatpush3.bf16.msra.mxu1 %v3302_v4 }
 0x1bb   :  { %2924 = vmatprep.subr.bf16.mxu0 %v3299_v9 }
 0x1be   :  { %2925 = vmatpush3.bf16.msra.mxu0 %v3300_v15 }
 0x26a   :  { %v4337_v57 = vpop.f32.mrb[16].mxu0  ;;  %v4339_v49 = vpop.f32.mrb[16].mxu1 }
 0x26b   :  { %v4341_v13 = vpop.f32.mrb[17].mxu0  ;;  %v4343_v19 = vpop.f32.mrb[17].mxu1  ;;  %v1938_v30 = vmul.f32 %v4337_v57, %v4337_v57  ;;  %v1940_v21 = vmul.f32 %v4339_v49, %v4339_v49 }
 0x26c   :  { %v1939_v27 = vmul.f32 %v4341_v13, %v4341_v13  ;;  %v1941_v41 = vmul.f32 %v4343_v19, %v4343_v19  ;;  %v4353_v20 = vpop.f32.mrb[18].mxu0  ;;  %v4355_v23 = vpop.f32.mrb[18].mxu1 }
 0x26d   :  { %v1882_v10 = vadd.f32 %v4353_v20, %v4337_v57  ;;  %v1942_v16 = vmul.f32 %v4353_v20, %v4353_v20  ;;  %v1908_v54 = vadd.f32 %v4355_v23, %v4339_v49  ;;  %v1944_v26 = vmul.f32 %v4355_v23, %v4355_v23  ;;  %v4365_v25 = vpop.f32.mrb[19].mxu0  ;;  %v4367_v35 = vpop.f32.mrb[19].mxu1 }
 0x26e   :  { %v1895_v29 = vadd.f32 %v4365_v25, %v4341_v13  ;;  %v1943_v53 = vmul.f32 %v4365_v25, %v4365_v25  ;;  %v1921_v11 = vadd.f32 %v4367_v35, %v4343_v19  ;;  %v1945_v40 = vmul.f32 %v4367_v35, %v4367_v35 }
 0x26f   :  { %v1970_v48 = vadd.f32 %v1942_v16, %v1938_v30  ;;  %v1996_v31 = vadd.f32 %v1944_v26, %v1940_v21 }
 0x270   :  { %v1983_v42 = vadd.f32 %v1943_v53, %v1939_v27  ;;  %v2009_v0 = vadd.f32 %v1945_v40, %v1941_v41 }
 0x272   :  { %v4377_v6 = vpop.f32.mrb[20].mxu0  ;;  %v4379_v18 = vpop.f32.mrb[20].mxu1 }
 0x273   :  { %v1883_v36 = vadd.f32 %v1882_v10, %v4377_v6  ;;  %v1946_v24 = vmul.f32 %v4377_v6, %v4377_v6  ;;  %v1909_v7 = vadd.f32 %v1908_v54, %v4379_v18  ;;  %v1948_v12 = vmul.f32 %v4379_v18, %v4379_v18  ;;  %v4387_v39 = vpop.f32.mrb[21].mxu0  ;;  %v4389_v28 = vpop.f32.mrb[21].mxu1 }
 0x274   :  { %v1896_v51 = vadd.f32 %v1895_v29, %v4387_v39  ;;  %v1947_v32 = vmul.f32 %v4387_v39, %v4387_v39  ;;  %v1922_v22 = vadd.f32 %v1921_v11, %v4389_v28  ;;  %v1949_v47 = vmul.f32 %v4389_v28, %v4389_v28  ;;  %v4397_v44 = vpop.f32.mrb[22].mxu0  ;;  %v4399_v62 = vpop.f32.mrb[22].mxu1 }
 0x275   :  { %v1971_v46 = vadd.f32 %v1970_v48, %v1946_v24  ;;  %v1997_v14 = vadd.f32 %v1996_v31, %v1948_v12  ;;  %v1884_v5 = vadd.f32 %v1883_v36, %v4397_v44  ;;  %v1950_v33 = vmul.f32 %v4397_v44, %v4397_v44  ;;  %v4404_v50 = vpop.f32.mrb[23].mxu0  ;;  %v4406_v2 = vpop.f32.mrb[23].mxu1 }
 0x276   :  { %v1984_v60 = vadd.f32 %v1983_v42, %v1947_v32  ;;  %v2010_v17 = vadd.f32 %v2009_v0, %v1949_v47  ;;  %v1910_v63 = vadd.f32 %v1909_v7, %v4399_v62  ;;  %v1952_v58 = vmul.f32 %v4399_v62, %v4399_v62 }
 0x277   :  { %v1972_v52 = vadd.f32 %v1971_v46, %v1950_v33  ;;  %v1897_v55 = vadd.f32 %v1896_v51, %v4404_v50  ;;  %v1951_v37 = vmul.f32 %v4404_v50, %v4404_v50  ;;  %v1923_v45 = vadd.f32 %v1922_v22, %v4406_v2 }
 0x278   :  { %v1998_v38 = vadd.f32 %v1997_v14, %v1952_v58  ;;  %v1953_v61 = vmul.f32 %v4406_v2, %v4406_v2 }
 0x279   :  { %v1985_v1 = vadd.f32 %v1984_v60, %v1951_v37 }
 0x27a   :  { %v2011_v9 = vadd.f32 %v2010_v17, %v1953_v61  ;;  %v4417_v8 = vpop.f32.mrb[24].mxu0  ;;  %v4419_v15 = vpop.f32.mrb[24].mxu1 }
 0x27b   :  { %v1885_v4 = vadd.f32 %v1884_v5, %v4417_v8  ;;  %v1954_v30 = vmul.f32 %v4417_v8, %v4417_v8  ;;  %v1911_v21 = vadd.f32 %v1910_v63, %v4419_v15  ;;  %v1956_v27 = vmul.f32 %v4419_v15, %v4419_v15  ;;  %v4427_v41 = vpop.f32.mrb[25].mxu0  ;;  %v4429_v10 = vpop.f32.mrb[25].mxu1 }
 0x27c   :  { %v1898_v16 = vadd.f32 %v1897_v55, %v4427_v41  ;;  %v1955_v54 = vmul.f32 %v4427_v41, %v4427_v41  ;;  %v1924_v26 = vadd.f32 %v1923_v45, %v4429_v10  ;;  %v1957_v29 = vmul.f32 %v4429_v10, %v4429_v10  ;;  %v4437_v53 = vpop.f32.mrb[26].mxu0  ;;  %v4439_v11 = vpop.f32.mrb[26].mxu1 }
 0x27d   :  { %v1973_v40 = vadd.f32 %v1972_v52, %v1954_v30  ;;  %v1999_v48 = vadd.f32 %v1998_v38, %v1956_v27  ;;  %v1886_v31 = vadd.f32 %v1885_v4, %v4437_v53  ;;  %v1958_v42 = vmul.f32 %v4437_v53, %v4437_v53  ;;  %v4444_v0 = vpop.f32.mrb[27].mxu0  ;;  %v4446_v36 = vpop.f32.mrb[27].mxu1 }
 0x27e   :  { %v1986_v24 = vadd.f32 %v1985_v1, %v1955_v54  ;;  %v2012_v7 = vadd.f32 %v2011_v9, %v1957_v29  ;;  %v1912_v12 = vadd.f32 %v1911_v21, %v4439_v11  ;;  %v1960_v51 = vmul.f32 %v4439_v11, %v4439_v11 }
 0x27f   :  { %v1974_v32 = vadd.f32 %v1973_v40, %v1958_v42  ;;  %v1899_v22 = vadd.f32 %v1898_v16, %v4444_v0  ;;  %v1959_v47 = vmul.f32 %v4444_v0, %v4444_v0  ;;  %v1925_v46 = vadd.f32 %v1924_v26, %v4446_v36 }
 0x280   :  { %v2000_v14 = vadd.f32 %v1999_v48, %v1960_v51  ;;  %v1961_v5 = vmul.f32 %v4446_v36, %v4446_v36 }
 0x281   :  { %v1987_v33 = vadd.f32 %v1986_v24, %v1959_v47 }
 0x282   :  { %v2013_v60 = vadd.f32 %v2012_v7, %v1961_v5  ;;  %v4457_v17 = vpop.f32.mrb[28].mxu0  ;;  %v4459_v63 = vpop.f32.mrb[28].mxu1 }
 0x283   :  { %4678 = vst [vmem:[#allocation6_spill] sm:$0xff] %v4457_v17  ;;  %4679 = vst [vmem:[#allocation7_spill] sm:$0xff] %v4459_v63  ;;  %v1887_v58 = vadd.f32 %v1886_v31, %v4457_v17  ;;  %v1962_v52 = vmul.f32 %v4457_v17, %v4457_v17  ;;  %v1913_v55 = vadd.f32 %v1912_v12, %v4459_v63  ;;  %v4467_v45 = vpop.f32.mrb[29].mxu0  ;;  %v4469_v38 = vpop.f32.mrb[29].mxu1 }
 0x284   :  { %v1964_v37 = vmul.f32 %v4459_v63, %v4459_v63  ;;  %4680 = vst [vmem:[#allocation8_spill] sm:$0xff] %v4469_v38  ;;  %v1900_v61 = vadd.f32 %v1899_v22, %v4467_v45  ;;  %v1963_v1 = vmul.f32 %v4467_v45, %v4467_v45  ;;  %v1926_v9 = vadd.f32 %v1925_v46, %v4469_v38  ;;  %v4477_v30 = vpop.f32.mrb[30].mxu0  ;;  %v4479_v21 = vpop.f32.mrb[30].mxu1 }
 0x285   :  { %v1965_v4 = vmul.f32 %v4469_v38, %v4469_v38  ;;  %4681 = vst [vmem:[#allocation9_spill] sm:$0xff] %v4477_v30  ;;  %4682 = vst [vmem:[#allocation10_spill] sm:$0xff] %v4479_v21  ;;  %v1975_v27 = vadd.f32 %v1974_v32, %v1962_v52  ;;  %v1888_v54 = vadd.f32 %v1887_v58, %v4477_v30  ;;  %v4484_v29 = vpop.f32.mrb[31].mxu0  ;;  %v4486_v40 = vpop.f32.mrb[31].mxu1 }
 0x286   :  { %v2001_v16 = vadd.f32 %v2000_v14, %v1964_v37  ;;  %v1966_v26 = vmul.f32 %v4477_v30, %v4477_v30  ;;  %4683 = vst [vmem:[#allocation11_spill] sm:$0xff] %v4484_v29  ;;  %v1988_v48 = vadd.f32 %v1987_v33, %v1963_v1  ;;  %v1914_v42 = vadd.f32 %v1913_v55, %v4479_v21 }
 0x287   :  { %v2014_v31 = vadd.f32 %v2013_v60, %v1965_v4  ;;  %v1968_v24 = vmul.f32 %v4479_v21, %v4479_v21  ;;  %v1889_v7 = vrot.slane %v1888_v54, 4  ;;  %v1901_v51 = vadd.f32 %v1900_v61, %v4484_v29 }
 0x288   :  { %v1976_v12 = vadd.f32 %v1975_v27, %v1966_v26  ;;  %v1967_v32 = vmul.f32 %v4484_v29, %v4484_v29  ;;  %v1915_v22 = vrot.slane %v1914_v42, 4  ;;  %v1927_v46 = vadd.f32 %v1926_v9, %v4486_v40 }
 0x289   :  { %v2002_v47 = vadd.f32 %v2001_v16, %v1968_v24  ;;  %v1969_v14 = vmul.f32 %v4486_v40, %v4486_v40  ;;  %v1890_v5 = vadd.f32 %v1889_v7, %v1888_v54  ;;  %v1902_v60 = vrot.slane %v1901_v51, 4 }
 0x28a   :  { %v1977_v33 = vrot.slane %v1976_v12, 4  ;;  %v1989_v58 = vadd.f32 %v1988_v48, %v1967_v32  ;;  %v1916_v52 = vadd.f32 %v1915_v22, %v1914_v42  ;;  %v1928_v37 = vrot.slane %v1927_v46, 4 }
 0x28b   :  { %v2003_v55 = vrot.slane %v2002_v47, 4  ;;  %v2015_v1 = vadd.f32 %v2014_v31, %v1969_v14  ;;  %v1891_v4 = vrot.slane %v1890_v5, 2  ;;  %v1903_v27 = vadd.f32 %v1902_v60, %v1901_v51 }
 0x28c   :  { %v1978_v61 = vadd.f32 %v1977_v33, %v1976_v12  ;;  %v1990_v26 = vrot.slane %v1989_v58, 4  ;;  %v1917_v21 = vrot.slane %v1916_v52, 2  ;;  %v1929_v16 = vadd.f32 %v1928_v37, %v1927_v46 }
 0x28d   :  { %v2004_v63 = vadd.f32 %v2003_v55, %v2002_v47  ;;  %v2016_v24 = vrot.slane %v2015_v1, 4  ;;  %v1892_v9 = vadd.f32 %v1891_v4, %v1890_v5  ;;  %v1904_v17 = vrot.slane %v1903_v27, 2 }
 0x28e   :  { %v1979_v30 = vrot.slane %v1978_v61, 2  ;;  %v1991_v38 = vadd.f32 %v1990_v26, %v1989_v58  ;;  %v1918_v54 = vadd.f32 %v1917_v21, %v1916_v52  ;;  %v1930_v29 = vrot.slane %v1929_v16, 2 }
 0x28f   :  { %v2005_v7 = vrot.slane %v2004_v63, 2  ;;  %v2017_v48 = vadd.f32 %v2016_v24, %v2015_v1  ;;  %v1893_v42 = vrot.slane %v1892_v9, 1  ;;  %v1905_v22 = vadd.f32 %v1904_v17, %v1903_v27 }
 0x290   :  { %v1980_v32 = vadd.f32 %v1979_v30, %v1978_v61  ;;  %v1992_v31 = vrot.slane %v1991_v38, 2  ;;  %v1919_v14 = vrot.slane %v1918_v54, 1  ;;  %v1931_v51 = vadd.f32 %v1930_v29, %v1929_v16 }
 0x291   :  { %v2006_v12 = vadd.f32 %v2005_v7, %v2004_v63  ;;  %v2018_v33 = vrot.slane %v2017_v48, 2  ;;  %v1894_v60 = vadd.f32 %v1893_v42, %v1892_v9  ;;  %v1906_v46 = vrot.slane %v1905_v22, 1 }
 0x292   :  { %v1981_v47 = vrot.slane %v1980_v32, 1  ;;  %v1993_v55 = vadd.f32 %v1992_v31, %v1991_v38  ;;  %v1920_v5 = vadd.f32 %v1919_v14, %v1918_v54  ;;  %v1932_v4 = vrot.slane %v1931_v51, 1 }
 0x293   :  { %v2007_v37 = vrot.slane %v2006_v12, 1  ;;  %v2019_v58 = vadd.f32 %v2018_v33, %v2017_v48  ;;  %v1934_v21 = vmul.f32 0.015625, %v1894_v60  ;;  %v1907_v26 = vadd.f32 %v1906_v46, %v1905_v22 }
 0x294   :  { %v1982_v52 = vadd.f32 %v1981_v47, %v1980_v32  ;;  %v1994_v1 = vrot.slane %v1993_v55, 1  ;;  %v1936_v24 = vmul.f32 0.015625, %v1920_v5  ;;  %v1933_v17 = vadd.f32 %v1932_v4, %v1931_v51 }
 0x295   :  { %v2008_v30 = vadd.f32 %v2007_v37, %v2006_v12  ;;  %v2020_v61 = vrot.slane %v2019_v58, 1  ;;  %v2026_v63 = vmul.f32 %v1934_v21, %v1934_v21  ;;  %v1935_v29 = vmul.f32 0.015625, %v1907_v26 }
 0x296   :  { %v2022_v27 = vmul.f32 0.015625, %v1982_v52  ;;  %v1995_v16 = vadd.f32 %v1994_v1, %v1993_v55  ;;  %v2028_v7 = vmul.f32 %v1936_v24, %v1936_v24  ;;  %v1937_v42 = vmul.f32 0.015625, %v1933_v17 }
 0x297   :  { %v2024_v9 = vmul.f32 0.015625, %v2008_v30  ;;  %v2021_v38 = vadd.f32 %v2020_v61, %v2019_v58  ;;  %v2027_v14 = vmul.f32 %v1935_v29, %v1935_v29 }
 0x298   :  { %v2030_v54 = vsub.f32 %v2022_v27, %v2026_v63  ;;  %v2023_v31 = vmul.f32 0.015625, %v1995_v16  ;;  %v2029_v32 = vmul.f32 %v1937_v42, %v1937_v42  ;;  %v1880_v16 = vld [vmem:[%s4664_s5] sm:$0xf] }
 0x299   :  { %v2032_v48 = vsub.f32 %v2024_v9, %v2028_v7  ;;  %v2025_v33 = vmul.f32 0.015625, %v2021_v38 }
 0x29a   :  { %v2034_v22 = vmax.f32 %v2030_v54, 0.0  ;;  %v2031_v60 = vsub.f32 %v2023_v31, %v2027_v14 }
 0x29b   :  { %v2036_v47 = vmax.f32 %v2032_v48, 0.0  ;;  %v2033_v12 = vsub.f32 %v2025_v33, %v2029_v32 }
 0x29c   :  { %v2038_v51 = vadd.f32 1e-05, %v2034_v22  ;;  %v2035_v46 = vmax.f32 %v2031_v60, 0.0 }
 0x29d   :  { %v2040_v5 = vadd.f32 1e-05, %v2036_v47  ;;  %v2037_v37 = vmax.f32 %v2033_v12, 0.0 }
 0x29e   :  { %3311 = vrsqrt.f32 %v2038_v51  ;;  %v2039_v55 = vadd.f32 1e-05, %v2035_v46 }
 0x29f   :  { %3313 = vrsqrt.f32 %v2040_v5  ;;  %v2041_v4 = vadd.f32 1e-05, %v2037_v37 }
 0x2a0   :  { %3315 = vrsqrt.f32 %v2039_v55 }
 0x2a1   :  { %3317 = vrsqrt.f32 %v2041_v4 }
 0x2a8   :  { %v3312_v58 = vpop.eup %3311 }
 0x2a9   :  { %v3314_v52 = vpop.eup %3313 }
 0x2aa   :  { %v3316_v26 = vpop.eup %3315 }
 0x2ab   :  { %v3318_v1 = vpop.eup %3317  ;;  %v2050_v30 = vcombine.low %v3312_v58, %v3316_v26  ;;  %v4686_v26 = vld [vmem:[#allocation6_spill] sm:$0xff] }
 0x2ac   :  { %v2051_v17 = vcombine.low %v3314_v52, %v3318_v1  ;;  %v4685_v52 = vld [vmem:[#allocation8_spill] sm:$0xff]  ;;  %v4687_v1 = vld [vmem:[#allocation9_spill] sm:$0xff] }
 0x2ad   :  { %v2058_v61 = vrot.slane %v2050_v30, %v3872_v34  ;;  %v4688_v30 = vld [vmem:[#allocation7_spill] sm:$0xff] }
 0x2ae   :  { %v2065_v27 = vrot.slane %v2051_v17, %v3872_v34 }
 0x2b0   :  { %v2066_v63 = vcombine.low %v2058_v61, %v2065_v27 }
 0x2b2   :  { %v2073_v9 = vrot.slane %v2066_v63, %v3872_v34 }
 0x2b4   :  { %v2075_v7 = vmul.f32 %v2073_v9, %v1880_v16 }
 0x2b6   :  { %v2080_v38 = vrot.slane %v2075_v7, %v3879_v43  ;;  %v2084_v54 = vrot.slane %v2075_v7, %v3882_v56  ;;  %v2088_v31 = vrot.slane %v2075_v7, %v3884_v59  ;;  %v2092_v14 = vrot.slane %v2075_v7, %v3886_v3 }
 0x2b8   :  { %v2097_v48 = vmul.f32 %v2080_v38, %v1934_v21  ;;  %v2098_v33 = vmul.f32 %v2084_v54, %v1935_v29  ;;  %v2099_v32 = vmul.f32 %v2088_v31, %v1936_v24  ;;  %v2100_v22 = vmul.f32 %v2092_v14, %v1937_v42 }
 0x2b9   :  { %v2162_v60 = vmul.f32 %v2092_v14, %v4486_v40  ;;  %v2132_v47 = vmul.f32 %v2084_v54, %v4341_v13  ;;  %v2136_v12 = vmul.f32 %v2084_v54, %v4365_v25  ;;  %v2134_v51 = vmul.f32 %v2092_v14, %v4343_v19 }
 0x2ba   :  { %v2105_v46 = vcombine.low %v2097_v48, %v2098_v33  ;;  %v2106_v5 = vcombine.low %v2099_v32, %v2100_v22  ;;  %v2138_v37 = vmul.f32 %v2092_v14, %v4367_v35  ;;  %v2131_v55 = vmul.f32 %v2080_v38, %v4337_v57 }
 0x2bb   :  { %v2135_v4 = vmul.f32 %v2080_v38, %v4353_v20  ;;  %v2133_v21 = vmul.f32 %v2088_v31, %v4339_v49  ;;  %v2137_v24 = vmul.f32 %v2088_v31, %v4355_v23  ;;  %v2140_v40 = vmul.f32 %v2084_v54, %v4387_v39 }
 0x2bc   :  { %v2113_v13 = vrot.slane %v2105_v46, %v3872_v34  ;;  %v2120_v25 = vrot.slane %v2106_v5, %v3872_v34  ;;  %v2144_v19 = vmul.f32 %v2084_v54, %v4404_v50  ;;  %v2142_v29 = vmul.f32 %v2092_v14, %v4389_v28  ;;  %v1881_v28 = vld [vmem:[%s4665_s6] sm:$0xf] }
 0x2bd   :  { %v2146_v35 = vmul.f32 %v2092_v14, %v4406_v2  ;;  %v2139_v57 = vmul.f32 %v2080_v38, %v4377_v6  ;;  %v2143_v20 = vmul.f32 %v2080_v38, %v4397_v44  ;;  %v2141_v49 = vmul.f32 %v2088_v31, %v4379_v18 }
 0x2be   :  { %v2121_v42 = vcombine.low %v2113_v13, %v2120_v25  ;;  %v2145_v23 = vmul.f32 %v2088_v31, %v4399_v62  ;;  %v2148_v39 = vmul.f32 %v2084_v54, %v4427_v41  ;;  %v4528_v58 = vmul.f32 %v2084_v54, %v4444_v0  ;;  %v4684_v0 = vld [vmem:[#allocation11_spill] sm:$0xff] }
 0x2bf   :  { %v4534_v50 = vmul.f32 %v2092_v14, %v4429_v10  ;;  %v4537_v6 = vmul.f32 %v2092_v14, %v4446_v36  ;;  %v4540_v18 = vmul.f32 %v2080_v38, %v4417_v8  ;;  %v4543_v44 = vmul.f32 %v2080_v38, %v4437_v53 }
 0x2c0   :  { %v2128_v62 = vrot.slane %v2121_v42, %v3872_v34  ;;  %v4547_v2 = vmul.f32 %v2088_v31, %v4419_v15  ;;  %v4550_v41 = vmul.f32 %v2088_v31, %v4439_v11  ;;  %v4553_v10 = vmul.f32 %v2084_v54, %v4467_v45  ;;  %v4689_v11 = vld [vmem:[#allocation10_spill] sm:$0xff] }
 0x2c1   :  { %v4556_v36 = vmul.f32 %v2084_v54, %v4684_v0  ;;  %v4559_v8 = vmul.f32 %v2092_v14, %v4685_v52  ;;  %v4562_v53 = vmul.f32 %v2080_v38, %v4686_v26  ;;  %v4565_v34 = vmul.f32 %v2080_v38, %v4687_v1 }
 0x2c2   :  { %v2130_v15 = vsub.f32 %v1881_v28, %v2128_v62  ;;  %v4568_v17 = vmul.f32 %v2088_v31, %v4688_v30  ;;  %v4571_v61 = vmul.f32 %v2088_v31, %v4689_v11 }
 0x2c4   :  { %v4574_v45 = vrot.slane %v2130_v15, %v3879_v43  ;;  %v4577_v27 = vrot.slane %v2130_v15, %v3882_v56  ;;  %v4580_v63 = vrot.slane %v2130_v15, %v3884_v59  ;;  %v4583_v16 = vrot.slane %v2130_v15, %v3886_v3 }
 0x2c6   :  { %v4586_v9 = vadd.f32 %v4583_v16, %v2162_v60  ;;  %v2185_v7 = vadd.f32 %v4577_v27, %v2132_v47  ;;  %v2189_v38 = vadd.f32 %v4577_v27, %v2136_v12  ;;  %v2187_v54 = vadd.f32 %v4583_v16, %v2134_v51 }
 0x2c7   :  { %v2191_v43 = vadd.f32 %v4583_v16, %v2138_v37  ;;  %v2184_v56 = vadd.f32 %v4574_v45, %v2131_v55  ;;  %v2188_v31 = vadd.f32 %v4574_v45, %v2135_v4  ;;  %v2186_v59 = vadd.f32 %v4580_v63, %v2133_v21 }
 0x2c8   :  { %v2217_v14 = vmax.f32 %v2185_v7, 0.0  ;;  %v2221_v3 = vmax.f32 %v2189_v38, 0.0  ;;  %v2219_v48 = vmax.f32 %v2187_v54, 0.0  ;;  %v2190_v33 = vadd.f32 %v4580_v63, %v2137_v24 }
 0x2c9   :  { %v2223_v32 = vmax.f32 %v2191_v43, 0.0  ;;  %v2216_v22 = vmax.f32 %v2184_v56, 0.0  ;;  %v2220_v60 = vmax.f32 %v2188_v31, 0.0  ;;  %v2218_v47 = vmax.f32 %v2186_v59, 0.0 }
 0x2ca   :  { %v2249_v12 = vpack.c.bf16 %v2221_v3, %v2217_v14  ;;  %v2222_v46 = vmax.f32 %v2190_v33, 0.0  ;;  %v2193_v51 = vadd.f32 %v4577_v27, %v2140_v40  ;;  %v2197_v5 = vadd.f32 %v4577_v27, %v2144_v19 }
 0x2cb   :  { %v2251_v37 = vpack.c.bf16 %v2223_v32, %v2219_v48  ;;  %v2248_v55 = vpack.c.bf16 %v2220_v60, %v2216_v22  ;;  %v2195_v4 = vadd.f32 %v4583_v16, %v2142_v29  ;;  %v2199_v21 = vadd.f32 %v4583_v16, %v2146_v35 }
 0x2cc   :  { %2591 = vmatprep.mubr.bf16.mxu0 %v2249_v12  ;;  %v2250_v13 = vpack.c.bf16 %v2222_v46, %v2218_v47  ;;  %v2225_v25 = vmax.f32 %v2193_v51, 0.0  ;;  %v2229_v24 = vmax.f32 %v2197_v5, 0.0  ;;  %v2192_v42 = vadd.f32 %v4574_v45, %v2139_v57 }
 0x2cd   :  { %2656 = vmatprep.mubr.bf16.mxu1 %v2251_v37  ;;  %2592 = vmatmul.mubr.bf16.vlgmr.msra.gmra.mrb[32].mxu0 %v2248_v55  ;;  %v2227_v28 = vmax.f32 %v2195_v4, 0.0  ;;  %v2231_v62 = vmax.f32 %v2199_v21, 0.0  ;;  %v2196_v40 = vadd.f32 %v4574_v45, %v2143_v20  ;;  %v2194_v19 = vadd.f32 %v4580_v63, %v2141_v49 }
 0x2ce   :  { %2657 = vmatmul.mubr.bf16.vlgmr.msra.gmra.mrb[32].mxu1 %v2250_v13  ;;  %v2253_v0 = vpack.c.bf16 %v2229_v24, %v2225_v25  ;;  %v2224_v52 = vmax.f32 %v2192_v42, 0.0  ;;  %v2198_v29 = vadd.f32 %v4580_v63, %v2145_v23  ;;  %v2201_v35 = vadd.f32 %v4577_v27, %v2148_v39 }
 0x2cf   :  { %v2255_v26 = vpack.c.bf16 %v2231_v62, %v2227_v28  ;;  %v2228_v1 = vmax.f32 %v2196_v40, 0.0  ;;  %v2226_v15 = vmax.f32 %v2194_v19, 0.0  ;;  %v2205_v57 = vadd.f32 %v4577_v27, %v4528_v58 }
 0x2d0   :  { %2599 = vmatprep.mubr.bf16.mxu0 %v2253_v0  ;;  %v2230_v30 = vmax.f32 %v2198_v29, 0.0  ;;  %v2233_v11 = vmax.f32 %v2201_v35, 0.0  ;;  %v2203_v20 = vadd.f32 %v4583_v16, %v4534_v50  ;;  %v2207_v49 = vadd.f32 %v4583_v16, %v4537_v6 }
 0x2d1   :  { %2664 = vmatprep.mubr.bf16.mxu1 %v2255_v26  ;;  %v2252_v7 = vpack.c.bf16 %v2228_v1, %v2224_v52  ;;  %v2237_v23 = vmax.f32 %v2205_v57, 0.0  ;;  %v2200_v39 = vadd.f32 %v4574_v45, %v4540_v18  ;;  %v2204_v38 = vadd.f32 %v4574_v45, %v4543_v44 }
 0x2d2   :  { %v2254_v54 = vpack.c.bf16 %v2230_v30, %v2226_v15  ;;  %v2235_v58 = vmax.f32 %v2203_v20, 0.0  ;;  %v2239_v43 = vmax.f32 %v2207_v49, 0.0  ;;  %v2202_v56 = vadd.f32 %v4580_v63, %v4547_v2 }
 0x2d3   :  { %v2257_v31 = vpack.c.bf16 %v2237_v23, %v2233_v11  ;;  %v2232_v50 = vmax.f32 %v2200_v39, 0.0  ;;  %v2236_v59 = vmax.f32 %v2204_v38, 0.0  ;;  %v2206_v6 = vadd.f32 %v4580_v63, %v4550_v41 }
 0x2d4   :  { %v2259_v14 = vpack.c.bf16 %v2239_v43, %v2235_v58  ;;  %v2234_v3 = vmax.f32 %v2202_v56, 0.0  ;;  %v2209_v18 = vadd.f32 %v4577_v27, %v4553_v10  ;;  %v2213_v44 = vadd.f32 %v4577_v27, %v4556_v36 }
 0x2d5   :  { %2600 = vmatmul.mubr.bf16.gmra.mrb[36].mxu0 %v2252_v7  ;;  %v2256_v48 = vpack.c.bf16 %v2236_v59, %v2232_v50  ;;  %v2238_v33 = vmax.f32 %v2206_v6, 0.0  ;;  %v2211_v2 = vadd.f32 %v4583_v16, %v4559_v8  ;;  %v2247_v32 = vmax.f32 %v4586_v9, 0.0 }
 0x2d6   :  { %2665 = vmatmul.mubr.bf16.gmra.mrb[36].mxu1 %v2254_v54  ;;  %2607 = vmatprep.mubr.bf16.mxu0 %v2257_v31  ;;  %v2241_v22 = vmax.f32 %v2209_v18, 0.0  ;;  %v2245_v41 = vmax.f32 %v2213_v44, 0.0  ;;  %v2208_v60 = vadd.f32 %v4574_v45, %v4562_v53  ;;  %v2212_v10 = vadd.f32 %v4574_v45, %v4565_v34 }
 0x2d7   :  { %2672 = vmatprep.mubr.bf16.mxu1 %v2259_v14  ;;  %v2258_v36 = vpack.c.bf16 %v2238_v33, %v2234_v3  ;;  %v2243_v27 = vmax.f32 %v2211_v2, 0.0  ;;  %v2210_v47 = vadd.f32 %v4580_v63, %v4568_v17  ;;  %v2214_v8 = vadd.f32 %v4580_v63, %v4571_v61  ;;  %v4637_v17 = vld [vmem:[%s4667_s8] ss:$0 sm:$0xff]  ;;  %s3345_s8 = smov [#allocation3]  }
 0x2d8   :  { %v2261_v16 = vpack.c.bf16 %v2245_v41, %v2241_v22  ;;  %v2240_v9 = vmax.f32 %v2208_v60, 0.0  ;;  %v2244_v12 = vmax.f32 %v2212_v10, 0.0  ;;  %s2702_s25 = sshll.u32 %s3345_s8, 4  ;;  %s2703_s25 = int_to_ptr.vmem [resolvable:$true] %s2702_s25 }
 0x2d9   :  { %v2263_v46 = vpack.c.bf16 %v2247_v32, %v2243_v27  ;;  %v2242_v51 = vmax.f32 %v2210_v47, 0.0  ;;  %v2246_v5 = vmax.f32 %v2214_v8, 0.0  ;;  %s3319_s26 = scalar_lea.vmem %s2703_s25, 1024  ;;  %p3324_p1 = scmp.lt.s32.totalorder %s2703_s25, %s2703_s25 }
 0x2da   :  { %v2260_v37 = vpack.c.bf16 %v2244_v12, %v2240_v9  ;;  %p3320_p0 = scmp.ne.s32.totalorder %s2703_s25, %s3319_s26  ;;  %p3325_p2 = scmp.lt.s32.totalorder %s3319_s26, %s3319_s26 }
 0x2db   :  { %v2262_v53 = vpack.c.bf16 %v2246_v5, %v2242_v51 }
 0x2dc   :  { %p3326_p3 = por %p3325_p2, %p3324_p1 }
 0x2dd   :  { %2608 = vmatmul.mubr.bf16.gmra.mrb[40].mxu0 %v2256_v48 }
 0x2de   :  { %2673 = vmatmul.mubr.bf16.gmra.mrb[40].mxu1 %v2258_v36  ;;  %2615 = vmatprep.mubr.bf16.mxu0 %v2261_v16  ;;  %p3327_p4 = pnand %p3326_p3, %p3320_p0 }
 0x2df   :  { %2680 = vmatprep.mubr.bf16.mxu1 %v2263_v46 }
 0x2e5   :  { %2616 = vmatmul.mubr.bf16.gmra.mrb[44].mxu0 %v2260_v37 }
 0x2e6   :  { %2681 = vmatmul.mubr.bf16.gmra.mrb[44].mxu1 %v2262_v53 }
 0x3a0   :  { %v2926_v34 = vpop.f32.mrb[32].mxu0 }
 0x3a1   :  { %v2966_v45 = vpop.f32.mrb[32].mxu1  ;;  %v2927_v61 = vpop.f32.mrb[33].mxu0 }
 0x3a2   :  { %v2928_v63 = vadd.f32 %v2927_v61, %v2926_v34  ;;  %v2967_v55 = vpop.f32.mrb[33].mxu1  ;;  %v2929_v4 = vpop.f32.mrb[34].mxu0 }
 0x3a3   :  { %v2968_v21 = vadd.f32 %v2967_v55, %v2966_v45  ;;  %v2969_v13 = vpop.f32.mrb[34].mxu1  ;;  %v2930_v25 = vpop.f32.mrb[35].mxu0 }
 0x3a4   :  { %v2594_v24 = vadd.f32 %v2928_v63, %v4637_v17  ;;  %v2931_v42 = vadd.f32 %v2930_v25, %v2929_v4  ;;  %v2970_v28 = vpop.f32.mrb[35].mxu1 }
 0x3a5   :  { %v2971_v62 = vadd.f32 %v2970_v28, %v2969_v13 }
 0x3a6   :  { %v2659_v40 = vadd.f32 %v2968_v21, %v2594_v24  ;;  %v2597_v19 = vadd.f32 %v2931_v42, %v4637_v17 }
 0x3a8   :  { %2689 = vst [vmem:[#allocation3] sm:$0xff] %v2659_v40  ;;  %v2662_v0 = vadd.f32 %v2971_v62, %v2597_v19  ;;  %v2932_v52 = vpop.f32.mrb[36].mxu0 }
 0x3a9   :  { %v2972_v29 = vpop.f32.mrb[36].mxu1  ;;  %v2933_v35 = vpop.f32.mrb[37].mxu0 }
 0x3aa   :  { %2690 = vst [vmem:[#allocation3 + $0x8] sm:$0xff] %v2662_v0  ;;  %v2934_v26 = vadd.f32 %v2933_v35, %v2932_v52  ;;  %v2973_v1 = vpop.f32.mrb[37].mxu1  ;;  %v2935_v15 = vpop.f32.mrb[38].mxu0 }
 0x3ab   :  { %v2974_v57 = vadd.f32 %v2973_v1, %v2972_v29  ;;  %v2975_v30 = vpop.f32.mrb[38].mxu1  ;;  %v2936_v11 = vpop.f32.mrb[39].mxu0 }
 0x3ac   :  { %v2602_v20 = vadd.f32 %v2934_v26, %v4637_v17  ;;  %v2937_v49 = vadd.f32 %v2936_v11, %v2935_v15  ;;  %v2976_v7 = vpop.f32.mrb[39].mxu1 }
 0x3ad   :  { %v2977_v23 = vadd.f32 %v2976_v7, %v2975_v30 }
 0x3ae   :  { %v2667_v39 = vadd.f32 %v2974_v57, %v2602_v20  ;;  %v2605_v38 = vadd.f32 %v2937_v49, %v4637_v17 }
 0x3b0   :  { %2691 = vst [vmem:[#allocation3 + $0x10] sm:$0xff] %v2667_v39  ;;  %v2670_v54 = vadd.f32 %v2977_v23, %v2605_v38  ;;  %v2938_v58 = vpop.f32.mrb[40].mxu0 }
 0x3b1   :  { %v2978_v43 = vpop.f32.mrb[40].mxu1  ;;  %v2939_v56 = vpop.f32.mrb[41].mxu0 }
 0x3b2   :  { %2692 = vst [vmem:[#allocation3 + $0x18] sm:$0xff] %v2670_v54  ;;  %v2940_v31 = vadd.f32 %v2939_v56, %v2938_v58  ;;  %v2979_v50 = vpop.f32.mrb[41].mxu1  ;;  %v2941_v59 = vpop.f32.mrb[42].mxu0 }
 0x3b3   :  { %v2980_v6 = vadd.f32 %v2979_v50, %v2978_v43  ;;  %v2981_v14 = vpop.f32.mrb[42].mxu1  ;;  %v2942_v3 = vpop.f32.mrb[43].mxu0 }
 0x3b4   :  { %v2610_v18 = vadd.f32 %v2940_v31, %v4637_v17  ;;  %v2943_v44 = vadd.f32 %v2942_v3, %v2941_v59  ;;  %v2982_v48 = vpop.f32.mrb[43].mxu1 }
 0x3b5   :  { %v2983_v33 = vadd.f32 %v2982_v48, %v2981_v14 }
 0x3b6   :  { %v2675_v2 = vadd.f32 %v2980_v6, %v2610_v18  ;;  %v2613_v32 = vadd.f32 %v2943_v44, %v4637_v17 }
 0x3b8   :  { %2693 = vst [vmem:[#allocation3 + $0x20] sm:$0xff] %v2675_v2  ;;  %v2678_v22 = vadd.f32 %v2983_v33, %v2613_v32  ;;  %v2944_v41 = vpop.f32.mrb[44].mxu0 }
 0x3b9   :  { %v2984_v60 = vpop.f32.mrb[44].mxu1  ;;  %v2945_v10 = vpop.f32.mrb[45].mxu0 }
 0x3ba   :  { %2694 = vst [vmem:[#allocation3 + $0x28] sm:$0xff] %v2678_v22  ;;  %v2946_v36 = vadd.f32 %v2945_v10, %v2944_v41  ;;  %v2985_v27 = vpop.f32.mrb[45].mxu1  ;;  %v2947_v47 = vpop.f32.mrb[46].mxu0 }
 0x3bb   :  { %v2986_v8 = vadd.f32 %v2985_v27, %v2984_v60  ;;  %v2987_v16 = vpop.f32.mrb[46].mxu1  ;;  %v2948_v9 = vpop.f32.mrb[47].mxu0 }
 0x3bc   :  { %v2618_v12 = vadd.f32 %v2946_v36, %v4637_v17  ;;  %v2949_v46 = vadd.f32 %v2948_v9, %v2947_v47  ;;  %v2988_v51 = vpop.f32.mrb[47].mxu1 }
 0x3bd   :  { %v2989_v5 = vadd.f32 %v2988_v51, %v2987_v16 }
 0x3be   :  { %v2683_v37 = vadd.f32 %v2986_v8, %v2618_v12  ;;  %v2621_v53 = vadd.f32 %v2949_v46, %v4637_v17 }
 0x3c0   :  { %2695 = vst [vmem:[#allocation3 + $0x30] sm:$0xff] %v2683_v37  ;;  %v2686_v34 = vadd.f32 %v2989_v5, %v2621_v53 }
 0x3c2   :  { %2696 = vst [vmem:[#allocation3 + $0x38] sm:$0xff] %v2686_v34 }
 0x3c3   :  { %3330 = shalt.err (!%p3327_p4)
}
 0x3c4   :  { %s3331_s29 = scalar_lea.hbm %s4668_s9, 1024 }
 0x3c5   :  { %p3332_p5 = scmp.ne.s32.totalorder %s4668_s9, %s3331_s29  ;;  %p3335_p6 = scmp.lt.u32.totalorder %s3331_s29, %s4668_s9 }
 0x3c7   :  { %p3337_p7 = pnand %p3335_p6, %p3332_p5 }
 0x3c9   :  { %3340 = shalt.err (!%p3337_p7)
}
 0x3ca   :  { %s3346_s13 = smov 128   ;;  %s3347_s2 = smov 8  }
 0x3cb   :  { %2708 = dma.vmem_to_hbm [thread:$0]  %s2703_s25, 1024, %s4668_s9, [#allocation4], %s3346_s13, %s3346_s13, %s3347_s2  }
 0x3cc   :  { %3341 = dma.done.wait [#allocation4], 1024  }
 0x3cd   :  { %3342 = vsyncadd [#allocation4], 4294966272 }
 0x3ce   :  { %2712 = vsyncpa [#allocation4], 1 }

</bundles_post_ra>
